<compile_context>
chip_gen: v5e
topology: v5e:2x2
jax: 0.10.0
libtpu: 0.0.40
codegen_flags: <defaults>
</compile_context>

<pallas_src>
import numpy as np
import jax
import jax.numpy as jnp
from jax.experimental import pallas as pl
from jax.experimental.pallas import tpu as pltpu


def _round_up(x, m):
    return ((x + m - 1) // m) * m


def cann_step_kernel(params_ref, wc_ref, wt_ref, r_ref, u_ref, inp_ref,
                     u_out_ref, r_out_ref):
    """One CANN Euler step, all scales at once.

    params_ref : SMEM f32[3] = [dt, tau, k]
    wc_ref     : VMEM bf16 (Lp, Lp)   = c * W   (circulant conv + roll, c folded in)
    wt_ref     : VMEM bf16 (Lp, Lp)   = W^T
    r_ref      : VMEM f32  (S, Lp, Lp) firing-rate state
    u_ref      : VMEM f32  (S, Lp, Lp) membrane-potential state
    inp_ref    : VMEM f32  (S, Lp, Lp) external input
    """
    dt = params_ref[0]
    tau = params_ref[1]
    k = params_ref[2]
    alpha = dt / tau                                   # scalar, once

    S, Lp, _ = r_ref.shape

    # ---- conn = (c*W) @ r @ W^T, batched over scales ----------------------
    # Right-hand side for all scales as ONE (S*Lp, Lp) x (Lp, Lp) MXU matmul.
    r_flat = r_ref[...].reshape(S * Lp, Lp).astype(jnp.bfloat16)
    rw = jnp.dot(r_flat, wt_ref[...], preferred_element_type=jnp.float32)
    rw = rw.astype(jnp.bfloat16)                       # feed MXU in bf16 again

    wc = wc_ref[...]                                   # bf16 (Lp, Lp)

    for s in range(S):                                 # S is tiny (3): static unroll
        conn_s = jnp.dot(wc, rw[s * Lp:(s + 1) * Lp, :],
                         preferred_element_type=jnp.float32)

        u_s = u_ref[s]
        u_new_s = u_s + alpha * (conn_s + inp_ref[s] - u_s)
        u_out_ref[s] = u_new_s

        # Global divisive normalization per scale (padded entries are 0, so
        # the sum equals the unpadded sum).
        usq = u_new_s * u_new_s
        ssum = jnp.sum(usq, keepdims=True)             # (1, 1)
        inv = pl.reciprocal(1.0 + k * ssum, approx=True)
        r_out_ref[s] = usq * inv


def make_cann_constants(L, scale_num, A=1.2, a=0.6):
    """Host-side constants: c*W (bf16, padded), W^T (bf16, padded) and the full
    2D Gaussian kernel (f32, only for the FFT reference check)."""
    rng = 2.0 * np.pi
    coords = np.arange(L, dtype=np.float64) / L * rng
    center = (L // 2) / L * rng
    dx = np.abs(coords - center)
    dx = np.where(dx > rng / 2.0, rng - dx, dx)        # ring distance
    gk = np.exp(-0.5 * (dx / a) ** 2)

    shift = L // 2 + 1
    ii = np.arange(L)[:, None]
    pp = np.arange(L)[None, :]
    W = gk[(ii - shift - pp) % L]                      # circulant (conv + roll)
    c = A / (2.0 * np.pi * a * a)

    Lp = _round_up(L, 128)                             # lane-dense padding
    Wc = np.zeros((Lp, Lp), dtype=np.float32)
    Wc[:L, :L] = (c * W).astype(np.float32)
    Wt = np.zeros((Lp, Lp), dtype=np.float32)
    Wt[:L, :L] = W.T.astype(np.float32)

    kernel2d = (A * np.exp(-0.5 * (dx[:, None] ** 2 + dx[None, :] ** 2) / a ** 2)
                / (2.0 * np.pi * a ** 2)).astype(np.float32)
    kernel2d = np.broadcast_to(kernel2d, (scale_num, L, L))
    return (jnp.asarray(Wc, dtype=jnp.bfloat16),
            jnp.asarray(Wt, dtype=jnp.bfloat16),
            jnp.asarray(kernel2d))


def cann_forward(u, r, inp, Wc, Wt, dt, tau, k):
    """Pallas implementation of CANN_Network.forward(input, dt).

    Returns (u_new, r_new); u_new is the module's return value, r_new the
    updated internal firing-rate state.
    """
    S, L, _ = u.shape
    Lp = Wc.shape[0]
    pad = Lp - L

    def pad3(x):
        return jnp.pad(x, ((0, 0), (0, pad), (0, pad))) if pad else x

    r_p, u_p, inp_p = pad3(r), pad3(u), pad3(inp)
    params = jnp.array([dt, tau, k], dtype=jnp.float32)

    u_new_p, r_new_p = pl.pallas_call(
        cann_step_kernel,
        out_shape=(jax.ShapeDtypeStruct((S, Lp, Lp), jnp.float32),
                   jax.ShapeDtypeStruct((S, Lp, Lp), jnp.float32)),
        # Grid-less: everything resident in VMEM for a single step (~10 MB at
        # the module default S=3, L=271 -> Lp=384).
        in_specs=[
            pl.BlockSpec(memory_space=pltpu.MemorySpace.SMEM),   # params
            pl.BlockSpec(memory_space=pltpu.MemorySpace.VMEM),   # c * W (bf16)
            pl.BlockSpec(memory_space=pltpu.MemorySpace.VMEM),   # W^T   (bf16)
            pl.BlockSpec(memory_space=pltpu.MemorySpace.VMEM),   # r state
            pl.BlockSpec(memory_space=pltpu.MemorySpace.VMEM),   # u state
            pl.BlockSpec(memory_space=pltpu.MemorySpace.VMEM),   # input
        ],
        out_specs=(
            pl.BlockSpec(memory_space=pltpu.MemorySpace.VMEM),   # u_new
            pl.BlockSpec(memory_space=pltpu.MemorySpace.VMEM),   # r_new
        ),
    )(params, Wc, Wt, r_p, u_p, inp_p)

    if pad:
        u_new_p = u_new_p[:, :L, :L]
        r_new_p = r_new_p[:, :L, :L]
    return u_new_p, r_new_p


def cann_forward_fft_ref(u, r, inp, kernel2d, dt, tau, k, L):
    """Pure-JAX replica of the PyTorch forward (FFT path), for verification."""
    fft_r = jnp.fft.fft2(r)
    conn = jnp.real(jnp.fft.ifft2(fft_r * jnp.fft.fft2(kernel2d)))
    shift = L // 2 + 1
    conn = jnp.roll(conn, shift=(shift, shift), axis=(1, 2))
    u_new = u + dt * (-u + conn + inp) / tau
    r_new = u_new ** 2 / (1.0 + k * jnp.sum(u_new ** 2, axis=(1, 2), keepdims=True))
    return u_new, r_new


if __name__ == "__main__":
    # Small shapes consistent with the module: scale_num=3, len=16 (default 271).
    S, L = 3, 16
    # Module defaults (sqrt-parameterized in __init__, squared in update_para).
    tau, A, k, a = 2.0, 1.2, 0.1, 0.6
    dt = 0.1

    key = jax.random.PRNGKey(0)
    k1, k2 = jax.random.split(key)
    u0 = jax.random.normal(k1, (S, L, L), dtype=jnp.float32)
    # r state defined exactly as in the module (u^2 with divisive normalization).
    r0 = (u0 ** 2) / (1.0 + k * jnp.sum(u0 ** 2, axis=(1, 2), keepdims=True))
    inp = 0.3 * jax.random.normal(k2, (S, L, L), dtype=jnp.float32)

    Wc, Wt, kernel2d = make_cann_constants(L, S, A=A, a=a)

    u_new, r_new = cann_forward(u0, r0, inp, Wc, Wt, dt, tau, k)
    jax.block_until_ready((u_new, r_new))

    # Verify against the FFT-based reference (the PyTorch semantics).
    u_ref, r_ref = cann_forward_fft_ref(u0, r0, inp, kernel2d, dt, tau, k, L)
    assert np.allclose(np.asarray(u_new), np.asarray(u_ref), atol=1e-3, rtol=1e-3)
    assert np.allclose(np.asarray(r_new), np.asarray(r_ref), atol=1e-3, rtol=1e-3)

    print("KERNEL_OK")
</pallas_src>

<mosaic_0001>
module attributes {stable_mosaic.version = 11 : i64} {
  func.func @cann_step_kernel(%arg0: memref<3xf32, #tpu.memory_space<smem>>, %arg1: memref<128x128xbf16, #tpu.memory_space<vmem>>, %arg2: memref<128x128xbf16, #tpu.memory_space<vmem>>, %arg3: memref<3x128x128xf32, #tpu.memory_space<vmem>>, %arg4: memref<3x128x128xf32, #tpu.memory_space<vmem>>, %arg5: memref<3x128x128xf32, #tpu.memory_space<vmem>>, %arg6: memref<3x128x128xf32, #tpu.memory_space<vmem>>, %arg7: memref<3x128x128xf32, #tpu.memory_space<vmem>>) attributes {dimension_semantics = [], scalar_prefetch = 0 : i64, scratch_operands = 0 : i64, tpu.core_type = #tpu.core_type<tc>} {
    %c0 = arith.constant 0 : index
    %0 = memref.load %arg0[%c0] : memref<3xf32, #tpu.memory_space<smem>>
    %c1 = arith.constant 1 : index
    %1 = memref.load %arg0[%c1] : memref<3xf32, #tpu.memory_space<smem>>
    %c2 = arith.constant 2 : index
    %2 = memref.load %arg0[%c2] : memref<3xf32, #tpu.memory_space<smem>>
    %3 = arith.divf %0, %1 : f32
    %c0_0 = arith.constant 0 : index
    %c0_1 = arith.constant 0 : index
    %c0_2 = arith.constant 0 : index
    %4 = vector.load %arg3[%c0_0, %c0_1, %c0_2] : memref<3x128x128xf32, #tpu.memory_space<vmem>>, vector<3x128x128xf32>
    %5 = vector.shape_cast %4 : vector<3x128x128xf32> to vector<384x128xf32>
    %6 = arith.truncf %5 : vector<384x128xf32> to vector<384x128xbf16>
    %c0_3 = arith.constant 0 : index
    %c0_4 = arith.constant 0 : index
    %7 = vector.load %arg2[%c0_3, %c0_4] : memref<128x128xbf16, #tpu.memory_space<vmem>>, vector<128x128xbf16>
    %cst = arith.constant dense<0.000000e+00> : vector<384x128xf32>
    %8 = tpu.matmul %6, %7, %cst {dimension_numbers = #tpu.dot_dimension_numbers<[1], [0], [0], [1], [0, 0, 1, 1], [], []>} : vector<384x128xbf16>, vector<128x128xbf16>, vector<384x128xf32> -> vector<384x128xf32>
    %9 = arith.truncf %8 : vector<384x128xf32> to vector<384x128xbf16>
    %c0_5 = arith.constant 0 : index
    %c0_6 = arith.constant 0 : index
    %10 = vector.load %arg1[%c0_5, %c0_6] : memref<128x128xbf16, #tpu.memory_space<vmem>>, vector<128x128xbf16>
    %11 = vector.extract_strided_slice %9 {offsets = [0, 0], sizes = [128, 128], strides = [1, 1]} : vector<384x128xbf16> to vector<128x128xbf16>
    %cst_7 = arith.constant dense<0.000000e+00> : vector<128x128xf32>
    %12 = tpu.matmul %10, %11, %cst_7 {dimension_numbers = #tpu.dot_dimension_numbers<[1], [0], [0], [1], [0, 0, 1, 1], [], []>} : vector<128x128xbf16>, vector<128x128xbf16>, vector<128x128xf32> -> vector<128x128xf32>
    %c0_8 = arith.constant 0 : index
    %c0_9 = arith.constant 0 : index
    %c0_10 = arith.constant 0 : index
    %13 = vector.load %arg4[%c0_8, %c0_9, %c0_10] : memref<3x128x128xf32, #tpu.memory_space<vmem>>, vector<1x128x128xf32>
    %14 = vector.shape_cast %13 : vector<1x128x128xf32> to vector<128x128xf32>
    %c0_11 = arith.constant 0 : index
    %c0_12 = arith.constant 0 : index
    %c0_13 = arith.constant 0 : index
    %15 = vector.load %arg5[%c0_11, %c0_12, %c0_13] : memref<3x128x128xf32, #tpu.memory_space<vmem>>, vector<1x128x128xf32>
    %16 = vector.shape_cast %15 : vector<1x128x128xf32> to vector<128x128xf32>
    %17 = arith.addf %12, %16 : vector<128x128xf32>
    %18 = arith.subf %17, %14 : vector<128x128xf32>
    %19 = vector.broadcast %3 : f32 to vector<128x128xf32>
    %20 = arith.mulf %19, %18 : vector<128x128xf32>
    %21 = arith.addf %14, %20 : vector<128x128xf32>
    %c0_14 = arith.constant 0 : index
    %c0_15 = arith.constant 0 : index
    %c0_16 = arith.constant 0 : index
    %22 = vector.load %arg6[%c0_14, %c0_15, %c0_16] : memref<3x128x128xf32, #tpu.memory_space<vmem>>, vector<1x128x128xf32>
    %23 = vector.shape_cast %22 : vector<1x128x128xf32> to vector<128x128xf32>
    %24 = vector.shape_cast %21 : vector<128x128xf32> to vector<1x128x128xf32>
    tpu.vector_store %arg6[%c0_14, %c0_15, %c0_16], %24 {strides = array<i32>} : memref<3x128x128xf32, #tpu.memory_space<vmem>>, vector<1x128x128xf32>,
    %25 = arith.mulf %21, %21 : vector<128x128xf32>
    %26 = vector.shape_cast %25 : vector<128x128xf32> to vector<1x128x128xf32>
    %cst_17 = arith.constant dense<0.000000e+00> : vector<1xf32>
    %27 = vector.multi_reduction <add>, %26, %cst_17 [1, 2] : vector<1x128x128xf32> to vector<1xf32>
    %28 = vector.shape_cast %27 : vector<1xf32> to vector<1x1x1xf32>
    %29 = vector.extract %28[0, 0, 0] : f32 from vector<1x1x1xf32>
    %30 = vector.broadcast %29 : f32 to vector<1x1xf32>
    %31 = vector.broadcast %2 : f32 to vector<1x1xf32>
    %32 = arith.mulf %31, %30 : vector<1x1xf32>
    %cst_18 = arith.constant 1.000000e+00 : f32
    %33 = vector.broadcast %cst_18 : f32 to vector<1x1xf32>
    %34 = arith.addf %33, %32 : vector<1x1xf32>
    %35 = tpu.reciprocal %34 {approx = true} : vector<1x1xf32> -> vector<1x1xf32>
    %36 = vector.broadcast %35 : vector<1x1xf32> to vector<128x128xf32>
    %37 = arith.mulf %25, %36 : vector<128x128xf32>
    %c0_19 = arith.constant 0 : index
    %c0_20 = arith.constant 0 : index
    %c0_21 = arith.constant 0 : index
    %38 = vector.load %arg7[%c0_19, %c0_20, %c0_21] : memref<3x128x128xf32, #tpu.memory_space<vmem>>, vector<1x128x128xf32>
    %39 = vector.shape_cast %38 : vector<1x128x128xf32> to vector<128x128xf32>
    %40 = vector.shape_cast %37 : vector<128x128xf32> to vector<1x128x128xf32>
    tpu.vector_store %arg7[%c0_19, %c0_20, %c0_21], %40 {strides = array<i32>} : memref<3x128x128xf32, #tpu.memory_space<vmem>>, vector<1x128x128xf32>,
    %41 = vector.extract_strided_slice %9 {offsets = [128, 0], sizes = [128, 128], strides = [1, 1]} : vector<384x128xbf16> to vector<128x128xbf16>
    %cst_22 = arith.constant dense<0.000000e+00> : vector<128x128xf32>
    %42 = tpu.matmul %10, %41, %cst_22 {dimension_numbers = #tpu.dot_dimension_numbers<[1], [0], [0], [1], [0, 0, 1, 1], [], []>} : vector<128x128xbf16>, vector<128x128xbf16>, vector<128x128xf32> -> vector<128x128xf32>
    %c1_23 = arith.constant 1 : index
    %c0_24 = arith.constant 0 : index
    %c0_25 = arith.constant 0 : index
    %43 = vector.load %arg4[%c1_23, %c0_24, %c0_25] : memref<3x128x128xf32, #tpu.memory_space<vmem>>, vector<1x128x128xf32>
    %44 = vector.shape_cast %43 : vector<1x128x128xf32> to vector<128x128xf32>
    %c1_26 = arith.constant 1 : index
    %c0_27 = arith.constant 0 : index
    %c0_28 = arith.constant 0 : index
    %45 = vector.load %arg5[%c1_26, %c0_27, %c0_28] : memref<3x128x128xf32, #tpu.memory_space<vmem>>, vector<1x128x128xf32>
    %46 = vector.shape_cast %45 : vector<1x128x128xf32> to vector<128x128xf32>
    %47 = arith.addf %42, %46 : vector<128x128xf32>
    %48 = arith.subf %47, %44 : vector<128x128xf32>
    %49 = vector.broadcast %3 : f32 to vector<128x128xf32>
    %50 = arith.mulf %49, %48 : vector<128x128xf32>
    %51 = arith.addf %44, %50 : vector<128x128xf32>
    %c1_29 = arith.constant 1 : index
    %c0_30 = arith.constant 0 : index
    %c0_31 = arith.constant 0 : index
    %52 = vector.load %arg6[%c1_29, %c0_30, %c0_31] : memref<3x128x128xf32, #tpu.memory_space<vmem>>, vector<1x128x128xf32>
    %53 = vector.shape_cast %52 : vector<1x128x128xf32> to vector<128x128xf32>
    %54 = vector.shape_cast %51 : vector<128x128xf32> to vector<1x128x128xf32>
    tpu.vector_store %arg6[%c1_29, %c0_30, %c0_31], %54 {strides = array<i32>} : memref<3x128x128xf32, #tpu.memory_space<vmem>>, vector<1x128x128xf32>,
    %55 = arith.mulf %51, %51 : vector<128x128xf32>
    %56 = vector.shape_cast %55 : vector<128x128xf32> to vector<1x128x128xf32>
    %cst_32 = arith.constant dense<0.000000e+00> : vector<1xf32>
    %57 = vector.multi_reduction <add>, %56, %cst_32 [1, 2] : vector<1x128x128xf32> to vector<1xf32>
    %58 = vector.shape_cast %57 : vector<1xf32> to vector<1x1x1xf32>
    %59 = vector.extract %58[0, 0, 0] : f32 from vector<1x1x1xf32>
    %60 = vector.broadcast %59 : f32 to vector<1x1xf32>
    %61 = vector.broadcast %2 : f32 to vector<1x1xf32>
    %62 = arith.mulf %61, %60 : vector<1x1xf32>
    %cst_33 = arith.constant 1.000000e+00 : f32
    %63 = vector.broadcast %cst_33 : f32 to vector<1x1xf32>
    %64 = arith.addf %63, %62 : vector<1x1xf32>
    %65 = tpu.reciprocal %64 {approx = true} : vector<1x1xf32> -> vector<1x1xf32>
    %66 = vector.broadcast %65 : vector<1x1xf32> to vector<128x128xf32>
    %67 = arith.mulf %55, %66 : vector<128x128xf32>
    %c1_34 = arith.constant 1 : index
    %c0_35 = arith.constant 0 : index
    %c0_36 = arith.constant 0 : index
    %68 = vector.load %arg7[%c1_34, %c0_35, %c0_36] : memref<3x128x128xf32, #tpu.memory_space<vmem>>, vector<1x128x128xf32>
    %69 = vector.shape_cast %68 : vector<1x128x128xf32> to vector<128x128xf32>
    %70 = vector.shape_cast %67 : vector<128x128xf32> to vector<1x128x128xf32>
    tpu.vector_store %arg7[%c1_34, %c0_35, %c0_36], %70 {strides = array<i32>} : memref<3x128x128xf32, #tpu.memory_space<vmem>>, vector<1x128x128xf32>,
    %71 = vector.extract_strided_slice %9 {offsets = [256, 0], sizes = [128, 128], strides = [1, 1]} : vector<384x128xbf16> to vector<128x128xbf16>
    %cst_37 = arith.constant dense<0.000000e+00> : vector<128x128xf32>
    %72 = tpu.matmul %10, %71, %cst_37 {dimension_numbers = #tpu.dot_dimension_numbers<[1], [0], [0], [1], [0, 0, 1, 1], [], []>} : vector<128x128xbf16>, vector<128x128xbf16>, vector<128x128xf32> -> vector<128x128xf32>
    %c2_38 = arith.constant 2 : index
    %c0_39 = arith.constant 0 : index
    %c0_40 = arith.constant 0 : index
    %73 = vector.load %arg4[%c2_38, %c0_39, %c0_40] : memref<3x128x128xf32, #tpu.memory_space<vmem>>, vector<1x128x128xf32>
    %74 = vector.shape_cast %73 : vector<1x128x128xf32> to vector<128x128xf32>
    %c2_41 = arith.constant 2 : index
    %c0_42 = arith.constant 0 : index
    %c0_43 = arith.constant 0 : index
    %75 = vector.load %arg5[%c2_41, %c0_42, %c0_43] : memref<3x128x128xf32, #tpu.memory_space<vmem>>, vector<1x128x128xf32>
    %76 = vector.shape_cast %75 : vector<1x128x128xf32> to vector<128x128xf32>
    %77 = arith.addf %72, %76 : vector<128x128xf32>
    %78 = arith.subf %77, %74 : vector<128x128xf32>
    %79 = vector.broadcast %3 : f32 to vector<128x128xf32>
    %80 = arith.mulf %79, %78 : vector<128x128xf32>
    %81 = arith.addf %74, %80 : vector<128x128xf32>
    %c2_44 = arith.constant 2 : index
    %c0_45 = arith.constant 0 : index
    %c0_46 = arith.constant 0 : index
    %82 = vector.load %arg6[%c2_44, %c0_45, %c0_46] : memref<3x128x128xf32, #tpu.memory_space<vmem>>, vector<1x128x128xf32>
    %83 = vector.shape_cast %82 : vector<1x128x128xf32> to vector<128x128xf32>
    %84 = vector.shape_cast %81 : vector<128x128xf32> to vector<1x128x128xf32>
    tpu.vector_store %arg6[%c2_44, %c0_45, %c0_46], %84 {strides = array<i32>} : memref<3x128x128xf32, #tpu.memory_space<vmem>>, vector<1x128x128xf32>,
    %85 = arith.mulf %81, %81 : vector<128x128xf32>
    %86 = vector.shape_cast %85 : vector<128x128xf32> to vector<1x128x128xf32>
    %cst_47 = arith.constant dense<0.000000e+00> : vector<1xf32>
    %87 = vector.multi_reduction <add>, %86, %cst_47 [1, 2] : vector<1x128x128xf32> to vector<1xf32>
    %88 = vector.shape_cast %87 : vector<1xf32> to vector<1x1x1xf32>
    %89 = vector.extract %88[0, 0, 0] : f32 from vector<1x1x1xf32>
    %90 = vector.broadcast %89 : f32 to vector<1x1xf32>
    %91 = vector.broadcast %2 : f32 to vector<1x1xf32>
    %92 = arith.mulf %91, %90 : vector<1x1xf32>
    %cst_48 = arith.constant 1.000000e+00 : f32
    %93 = vector.broadcast %cst_48 : f32 to vector<1x1xf32>
    %94 = arith.addf %93, %92 : vector<1x1xf32>
    %95 = tpu.reciprocal %94 {approx = true} : vector<1x1xf32> -> vector<1x1xf32>
    %96 = vector.broadcast %95 : vector<1x1xf32> to vector<128x128xf32>
    %97 = arith.mulf %85, %96 : vector<128x128xf32>
    %c2_49 = arith.constant 2 : index
    %c0_50 = arith.constant 0 : index
    %c0_51 = arith.constant 0 : index
    %98 = vector.load %arg7[%c2_49, %c0_50, %c0_51] : memref<3x128x128xf32, #tpu.memory_space<vmem>>, vector<1x128x128xf32>
    %99 = vector.shape_cast %98 : vector<1x128x128xf32> to vector<128x128xf32>
    %100 = vector.shape_cast %97 : vector<128x128xf32> to vector<1x128x128xf32>
    tpu.vector_store %arg7[%c2_49, %c0_50, %c0_51], %100 {strides = array<i32>} : memref<3x128x128xf32, #tpu.memory_space<vmem>>, vector<1x128x128xf32>,
    return
  }
}

</mosaic_0001>

<bundles_post_ra>
// kernel: tpu_custom_call.1
= control target key start
LH: loop header
LB: loop body
LE: loop exit
PB: predicated region body
PF: predicated region fallthrough
CT: control target
= control target key end

     0   :  { %13 = vsyncpa [#allocation5], 0  ;;  %s2379_s0 = inlined_call_operand.hbm [shape: f32[3], index: 0, kind: input, shape index: {}]   ;;  %s2380_s1 = inlined_call_operand.hbm [shape: bf16[128,128], index: 1, kind: input, shape index: {}]   ;;  %s2381_s2 = inlined_call_operand.hbm [shape: bf16[128,128], index: 2, kind: input, shape index: {}]   ;;  %s2382_s3 = inlined_call_operand.hbm [shape: f32[3,128,128], index: 3, kind: input, shape index: {}]   ;;  %s2383_s4 = inlined_call_operand.hbm [shape: f32[3,128,128], index: 4, kind: input, shape index: {}]   ;;  %s2384_s5 = inlined_call_operand.hbm [shape: f32[3,128,128], index: 5, kind: input, shape index: {}]   ;;  %s2385_s6 = inlined_call_operand.hbm [shape: f32[3,128,128], index: 6, kind: output, shape index: {0}]   ;;  %s2386_s7 = inlined_call_operand.hbm [shape: f32[3,128,128], index: 7, kind: output, shape index: {1}]  }
   0x1   :  { %14 = vsyncpa [#allocation3], 0 }
   0x2   :  { %15 = vsyncpa [#allocation8], 0 }
   0x3   :  { %16 = vsyncpa [#allocation11], 0 }
   0x4   :  { %17 = vsyncpa [#allocation4], 0 }
   0x5   :  { %18 = vsyncpa [#allocation15], 0  ;;  %s45_s26 = sshll.u32 %s2381_s2, 4  ;;  %s1698_s27 = smov [#allocation7]   ;;  %s46_s26 = int_to_ptr.hbm [resolvable:$true] %s45_s26 }
   0x6   :  { %s47_s28 = sshll.u32 %s1698_s27, 4  ;;  %s1699_s29 = smov 64   ;;  %s48_s28 = int_to_ptr.vmem [resolvable:$true] %s47_s28 }
   0x7   :  { %s1700_s30 = smov 4   ;;  %s71_s10 = sshll.u32 %s2383_s4, 4  ;;  %s72_s10 = int_to_ptr.hbm [resolvable:$true] %s71_s10 }
   0x8   :  { %53 = dma.hbm_to_vmem [thread:$0]  %s46_s26, 1024, %s48_s28, [#allocation8], %s1699_s29, %s1699_s29, %s1700_s30  }
   0x9   :  { %s1701_s11 = smov [#allocation10]   ;;  %s24_s15 = sshll.u32 %s2379_s0, 4  ;;  %s25_s15 = int_to_ptr.hbm [resolvable:$true] %s24_s15 }
   0xa   :  { %s73_s12 = sshll.u32 %s1701_s11, 4  ;;  %s1702_s2 = smov 128   ;;  %s74_s12 = int_to_ptr.vmem [resolvable:$true] %s73_s12 }
   0xb   :  { %s1703_s16 = smov 8   ;;  %s32_s19 = sshll.u32 %s2380_s1, 4  ;;  %s33_s19 = int_to_ptr.hbm [resolvable:$true] %s32_s19 }
   0xc   :  { %79 = dma.hbm_to_vmem [thread:$0]  %s72_s10, 6144, %s74_s12, [#allocation11], %s1702_s2, %s1702_s2, %s1703_s16  }
   0xd   :  { %s1704_s4 = smov [#allocation2]   ;;  %s1705_s20 = smov [#allocation6]  }
   0xe   :  { %27 = dma.hbm_to_smem %s25_s15, 16, %s1704_s4, [#allocation5]  }
   0xf   :  { %s34_s21 = sshll.u32 %s1705_s20, 4  ;;  %s58_s0 = sshll.u32 %s2382_s3, 4  ;;  %s35_s21 = int_to_ptr.vmem [resolvable:$true] %s34_s21  ;;  %s59_s0 = int_to_ptr.hbm [resolvable:$true] %s58_s0 }
  0x10   :  { %40 = dma.hbm_to_vmem [thread:$0]  %s33_s19, 1024, %s35_s21, [#allocation3], %s1699_s29, %s1699_s29, %s1700_s30  }
  0x11   :  { %s84_s26 = sshll.u32 %s2384_s5, 4  ;;  %s1706_s27 = smov [#allocation9]   ;;  %s85_s26 = int_to_ptr.hbm [resolvable:$true] %s84_s26 }
  0x12   :  { %s60_s28 = sshll.u32 %s1706_s27, 4  ;;  %s1707_s1 = smov [#allocation12]   ;;  %s61_s28 = int_to_ptr.vmem [resolvable:$true] %s60_s28 }
  0x13   :  { %66 = dma.hbm_to_vmem [thread:$0]  %s59_s0, 6144, %s61_s28, [#allocation8], %s1702_s2, %s1702_s2, %s1703_s16  }
  0x14   :  { %s86_s8 = sshll.u32 %s1707_s1, 4  ;;  %s87_s8 = int_to_ptr.vmem [resolvable:$true] %s86_s8 }
  0x15   :  { %92 = dma.hbm_to_vmem [thread:$0]  %s85_s26, 6144, %s87_s8, [#allocation11], %s1702_s2, %s1702_s2, %s1703_s16  }
  0x16   :  { %1686 = dma.done.wait [#allocation5], 16  }
  0x17   :  { %1687 = vsyncadd [#allocation5], 4294967280 }
  0x18   :  { %1688 = dma.done.wait [#allocation3], 1024  }
  0x19   :  { %1689 = vsyncadd [#allocation3], 4294966272 }
  0x1a   :  { %1690 = dma.done.wait [#allocation8], 7168  }
  0x1b   :  { %1691 = vsyncadd [#allocation8], 4294960128 }
  0x1c   :  { %1692 = dma.done.wait [#allocation11], 12288  }
  0x1d   :  { %1693 = vsyncadd [#allocation11], 4294955008 }
  0x1e   :  { %117 = sfence }
  0x1f   :  { %v1445_v0 = vld [vmem:[#allocation7 + $0x38] sm:$0xff]  ;;  %v1444_v1 = vld [vmem:[#allocation7 + $0x30] sm:$0xff]  ;;  %v1443_v2 = vld [vmem:[#allocation7 + $0x28] sm:$0xff]  ;;  %s1372_s3 = sld [smem:[#allocation2 + $0x1]]  ;;  %s1708_s11 = smov [#allocation13]  }
  0x20   :  { %274 = vmatpush.bf16.msra.mxu0 %v1445_v0  ;;  %1454 = vmatpush.bf16.msra.mxu1 %v1445_v0  ;;  %v1442_v3 = vld [vmem:[#allocation7 + $0x20] sm:$0xff]  ;;  %v1441_v4 = vld [vmem:[#allocation7 + $0x18] sm:$0xff]  ;;  %v1440_v5 = vld [vmem:[#allocation7 + $0x10] sm:$0xff]  ;;  %s118_s5 = sld [smem:[#allocation2]]  ;;  %s1336_s12 = sshll.u32 %s1708_s11, 4  ;;  %s1337_s12 = int_to_ptr.vmem [resolvable:$true] %s1336_s12 }
  0x21   :  { %v1439_v6 = vld [vmem:[#allocation7 + $0x8] sm:$0xff]  ;;  %v1438_v7 = vld [vmem:[#allocation7] sm:$0xff]  ;;  %v140_v14 = vld [vmem:[#allocation9 + $0x10] sm:$0xff]  ;;  %s1373_s9 = sld [smem:[#allocation2 + $0x2]]  ;;  %s1338_s15 = sshll.u32 %s2385_s6, 4  ;;  %s1339_s15 = int_to_ptr.hbm [resolvable:$true] %s1338_s15 }
  0x22   :  { %v138_v8 = vld [vmem:[#allocation9] sm:$0xff]  ;;  %v139_v9 = vld [vmem:[#allocation9 + $0x8] sm:$0xff]  ;;  %v141_v15 = vld [vmem:[#allocation9 + $0x18] sm:$0xff]  ;;  %s1709_s18 = smov [#allocation14]   ;;  %s1351_s21 = sshll.u32 %s2386_s7, 4  ;;  %s1352_s21 = int_to_ptr.hbm [resolvable:$true] %s1351_s21 }
  0x23   :  { %v162_v10 = vld [vmem:[#allocation9 + $0xc0] sm:$0xff]  ;;  %v163_v11 = vld [vmem:[#allocation9 + $0xc8] sm:$0xff]  ;;  %v186_v12 = vpack.c.bf16 %v139_v9, %v138_v8  ;;  %v164_v16 = vld [vmem:[#allocation9 + $0xd0] sm:$0xff]  ;;  %v187_v18 = vpack.c.bf16 %v141_v15, %v140_v14  ;;  %s1349_s19 = sshll.u32 %s1709_s18, 4  ;;  %s1350_s19 = int_to_ptr.vmem [resolvable:$true] %s1349_s19 }
  0x24   :  { %275 = vmatpush.bf16.msra.mxu0 %v1444_v1  ;;  %1455 = vmatpush.bf16.msra.mxu1 %v1444_v1  ;;  %v198_v13 = vpack.c.bf16 %v163_v11, %v162_v10  ;;  %v165_v17 = vld [vmem:[#allocation9 + $0xd8] sm:$0xff]  ;;  %v142_v20 = vld [vmem:[#allocation9 + $0x20] sm:$0xff]  ;;  %v143_v21 = vld [vmem:[#allocation9 + $0x28] sm:$0xff] }
  0x25   :  { %v199_v19 = vpack.c.bf16 %v165_v17, %v164_v16  ;;  %v166_v22 = vld [vmem:[#allocation9 + $0xe0] sm:$0xff]  ;;  %v167_v23 = vld [vmem:[#allocation9 + $0xe8] sm:$0xff]  ;;  %v188_v24 = vpack.c.bf16 %v143_v21, %v142_v20  ;;  %v144_v26 = vld [vmem:[#allocation9 + $0x30] sm:$0xff] }
  0x26   :  { %v200_v25 = vpack.c.bf16 %v167_v23, %v166_v22  ;;  %v145_v27 = vld [vmem:[#allocation9 + $0x38] sm:$0xff]  ;;  %v168_v28 = vld [vmem:[#allocation9 + $0xf0] sm:$0xff]  ;;  %v146_v32 = vld [vmem:[#allocation9 + $0x40] sm:$0xff] }
  0x27   :  { %v169_v29 = vld [vmem:[#allocation9 + $0xf8] sm:$0xff]  ;;  %v189_v30 = vpack.c.bf16 %v145_v27, %v144_v26  ;;  %v147_v33 = vld [vmem:[#allocation9 + $0x48] sm:$0xff]  ;;  %v170_v34 = vld [vmem:[#allocation9 + $0x100] sm:$0xff] }
  0x28   :  { %276 = vmatpush.bf16.msra.mxu0 %v1443_v2  ;;  %1456 = vmatpush.bf16.msra.mxu1 %v1443_v2  ;;  %v201_v31 = vpack.c.bf16 %v169_v29, %v168_v28  ;;  %v171_v35 = vld [vmem:[#allocation9 + $0x108] sm:$0xff]  ;;  %v190_v36 = vpack.c.bf16 %v147_v33, %v146_v32  ;;  %v148_v38 = vld [vmem:[#allocation9 + $0x50] sm:$0xff]  ;;  %v149_v39 = vld [vmem:[#allocation9 + $0x58] sm:$0xff] }
  0x29   :  { %v202_v37 = vpack.c.bf16 %v171_v35, %v170_v34  ;;  %v172_v40 = vld [vmem:[#allocation9 + $0x110] sm:$0xff]  ;;  %v173_v41 = vld [vmem:[#allocation9 + $0x118] sm:$0xff]  ;;  %v191_v42 = vpack.c.bf16 %v149_v39, %v148_v38  ;;  %v150_v44 = vld [vmem:[#allocation9 + $0x60] sm:$0xff] }
  0x2a   :  { %v203_v43 = vpack.c.bf16 %v173_v41, %v172_v40  ;;  %v151_v45 = vld [vmem:[#allocation9 + $0x68] sm:$0xff]  ;;  %v174_v46 = vld [vmem:[#allocation9 + $0x120] sm:$0xff]  ;;  %v152_v50 = vld [vmem:[#allocation9 + $0x70] sm:$0xff] }
  0x2b   :  { %v175_v47 = vld [vmem:[#allocation9 + $0x128] sm:$0xff]  ;;  %v192_v48 = vpack.c.bf16 %v151_v45, %v150_v44  ;;  %v153_v51 = vld [vmem:[#allocation9 + $0x78] sm:$0xff]  ;;  %v176_v52 = vld [vmem:[#allocation9 + $0x130] sm:$0xff] }
  0x2c   :  { %277 = vmatpush.bf16.msra.mxu0 %v1442_v3  ;;  %1457 = vmatpush.bf16.msra.mxu1 %v1442_v3  ;;  %v204_v49 = vpack.c.bf16 %v175_v47, %v174_v46  ;;  %v177_v53 = vld [vmem:[#allocation9 + $0x138] sm:$0xff]  ;;  %v193_v54 = vpack.c.bf16 %v153_v51, %v152_v50  ;;  %v154_v56 = vld [vmem:[#allocation9 + $0x80] sm:$0xff]  ;;  %v155_v57 = vld [vmem:[#allocation9 + $0x88] sm:$0xff] }
  0x2d   :  { %v205_v55 = vpack.c.bf16 %v177_v53, %v176_v52  ;;  %v178_v58 = vld [vmem:[#allocation9 + $0x140] sm:$0xff]  ;;  %v179_v59 = vld [vmem:[#allocation9 + $0x148] sm:$0xff]  ;;  %v194_v60 = vpack.c.bf16 %v155_v57, %v154_v56  ;;  %v180_v8 = vld [vmem:[#allocation9 + $0x150] sm:$0xff] }
  0x2e   :  { %v206_v61 = vpack.c.bf16 %v179_v59, %v178_v58  ;;  %v181_v9 = vld [vmem:[#allocation9 + $0x158] sm:$0xff]  ;;  %v159_v26 = vld [vmem:[#allocation9 + $0xa8] sm:$0xff]  ;;  %v182_v27 = vld [vmem:[#allocation9 + $0x160] sm:$0xff] }
  0x2f   :  { %v183_v28 = vld [vmem:[#allocation9 + $0x168] sm:$0xff]  ;;  %v160_v45 = vld [vmem:[#allocation9 + $0xb0] sm:$0xff]  ;;  %v161_v46 = vld [vmem:[#allocation9 + $0xb8] sm:$0xff] }
  0x30   :  { %278 = vmatpush.bf16.msra.mxu0 %v1441_v4  ;;  %1458 = vmatpush.bf16.msra.mxu1 %v1441_v4  ;;  %v208_v32 = vpack.c.bf16 %v183_v28, %v182_v27  ;;  %v184_v47 = vld [vmem:[#allocation9 + $0x170] sm:$0xff]  ;;  %v197_v51 = vpack.c.bf16 %v161_v46, %v160_v45 }
  0x34   :  { %279 = vmatpush.bf16.msra.mxu0 %v1440_v5  ;;  %1459 = vmatpush.bf16.msra.mxu1 %v1440_v5 }
  0x38   :  { %280 = vmatpush.bf16.msra.mxu0 %v1439_v6  ;;  %1460 = vmatpush.bf16.msra.mxu1 %v1439_v6  ;;  %v156_v6 = vld [vmem:[#allocation9 + $0x90] sm:$0xff] }
  0x3c   :  { %281 = vmatpush.bf16.msra.mxu0 %v1438_v7  ;;  %1461 = vmatpush.bf16.msra.mxu1 %v1438_v7  ;;  %v157_v7 = vld [vmem:[#allocation9 + $0x98] sm:$0xff] }
  0x3d   :  { %v195_v11 = vpack.c.bf16 %v157_v7, %v156_v6 }
  0x3f   :  { %282 = vmatmul.bf16.vlgmr.msra.gmra.mxu0 %v186_v12  ;;  %342 = vmatmul.bf16.vlgmr.msra.gmra.mxu1 %v198_v13  ;;  %v207_v12 = vpack.c.bf16 %v181_v9, %v180_v8 }
  0x4f   :  { %287 = vmatmul.bf16.gmra.mxu0 %v187_v18  ;;  %347 = vmatmul.bf16.gmra.mxu1 %v199_v19 }
  0x5f   :  { %292 = vmatmul.bf16.gmra.mxu0 %v188_v24  ;;  %352 = vmatmul.bf16.gmra.mxu1 %v200_v25  ;;  %v158_v25 = vld [vmem:[#allocation9 + $0xa0] sm:$0xff] }
  0x6f   :  { %297 = vmatmul.bf16.gmra.mxu0 %v189_v30  ;;  %357 = vmatmul.bf16.gmra.mxu1 %v201_v31  ;;  %v196_v31 = vpack.c.bf16 %v159_v26, %v158_v25 }
  0x7f   :  { %302 = vmatmul.bf16.gmra.mxu0 %v190_v36  ;;  %362 = vmatmul.bf16.gmra.mxu1 %v202_v37 }
  0x8f   :  { %307 = vmatmul.bf16.gmra.mxu0 %v191_v42  ;;  %367 = vmatmul.bf16.gmra.mxu1 %v203_v43 }
  0x9f   :  { %312 = vmatmul.bf16.gmra.mxu0 %v192_v48  ;;  %372 = vmatmul.bf16.gmra.mxu1 %v204_v49  ;;  %v185_v48 = vld [vmem:[#allocation9 + $0x178] sm:$0xff] }
  0xa0   :  { %v209_v52 = vpack.c.bf16 %v185_v48, %v184_v47 }
  0xaf   :  { %317 = vmatmul.bf16.gmra.mxu0 %v193_v54  ;;  %377 = vmatmul.bf16.gmra.mxu1 %v205_v55 }
  0xbc   :  { %v283_v62 = vpop.f32.mrf.mxu0  ;;  %v1777_v63 = vpop.f32.mrf.mxu1 }
  0xbd   :  { %v403_v0 = vpack.c.bf16 %v283_v62, %v283_v62 }
  0xbf   :  { %322 = vmatmul.bf16.gmra.mxu0 %v194_v60  ;;  %382 = vmatmul.bf16.gmra.mxu1 %v206_v61  ;;  %v563_v4 = vunpack.c.l.b16 %v403_v0 }
  0xc4   :  { %v285_v1 = vpop.f32.mrf.mxu0  ;;  %v1779_v2 = vpop.f32.mrf.mxu1 }
  0xc5   :  { %v404_v3 = vpack.c.bf16 %v285_v1, %v285_v1 }
  0xc7   :  { %v564_v5 = vunpack.c.l.b16 %v404_v3 }
  0xc9   :  { %v1781_v10 = vpack.c.b16 %v564_v5, %v563_v4 }
  0xcc   :  { %v288_v13 = vpop.f32.mrf.mxu0  ;;  %v348_v14 = vpop.f32.mrf.mxu1 }
  0xcd   :  { %v405_v15 = vpack.c.bf16 %v288_v13, %v288_v13  ;;  %v429_v16 = vpack.c.bf16 %v348_v14, %v348_v14 }
  0xcf   :  { %327 = vmatmul.bf16.gmra.mxu0 %v195_v11  ;;  %387 = vmatmul.bf16.gmra.mxu1 %v207_v12  ;;  %v565_v21 = vunpack.c.l.b16 %v405_v15  ;;  %v1783_v22 = vunpack.c.l.b16 %v429_v16 }
  0xd4   :  { %v290_v17 = vpop.f32.mrf.mxu0  ;;  %v350_v18 = vpop.f32.mrf.mxu1 }
  0xd5   :  { %v406_v19 = vpack.c.bf16 %v290_v17, %v290_v17  ;;  %v430_v20 = vpack.c.bf16 %v350_v18, %v350_v18 }
  0xd7   :  { %v566_v23 = vunpack.c.l.b16 %v406_v19  ;;  %v1785_v24 = vunpack.c.l.b16 %v430_v20 }
  0xd9   :  { %v1787_v29 = vpack.c.b16 %v566_v23, %v565_v21  ;;  %v857_v30 = vpack.c.b16 %v1785_v24, %v1783_v22 }
  0xdc   :  { %v293_v33 = vpop.f32.mrf.mxu0  ;;  %v353_v34 = vpop.f32.mrf.mxu1 }
  0xdd   :  { %v407_v35 = vpack.c.bf16 %v293_v33, %v293_v33  ;;  %v431_v36 = vpack.c.bf16 %v353_v34, %v353_v34 }
  0xdf   :  { %332 = vmatmul.bf16.gmra.mxu0 %v196_v31  ;;  %392 = vmatmul.bf16.gmra.mxu1 %v208_v32  ;;  %v567_v41 = vunpack.c.l.b16 %v407_v35  ;;  %v1791_v42 = vunpack.c.l.b16 %v431_v36 }
  0xe4   :  { %v295_v37 = vpop.f32.mrf.mxu0  ;;  %v355_v38 = vpop.f32.mrf.mxu1 }
  0xe5   :  { %v408_v39 = vpack.c.bf16 %v295_v37, %v295_v37  ;;  %v432_v40 = vpack.c.bf16 %v355_v38, %v355_v38 }
  0xe7   :  { %v568_v43 = vunpack.c.l.b16 %v408_v39  ;;  %v1793_v44 = vunpack.c.l.b16 %v432_v40 }
  0xe9   :  { %v1795_v49 = vpack.c.b16 %v568_v43, %v567_v41  ;;  %v858_v50 = vpack.c.b16 %v1793_v44, %v1791_v42 }
  0xec   :  { %v298_v53 = vpop.f32.mrf.mxu0  ;;  %v358_v54 = vpop.f32.mrf.mxu1 }
  0xed   :  { %v409_v55 = vpack.c.bf16 %v298_v53, %v298_v53  ;;  %v433_v56 = vpack.c.bf16 %v358_v54, %v358_v54 }
  0xef   :  { %337 = vmatmul.bf16.gmra.mxu0 %v197_v51  ;;  %397 = vmatmul.bf16.gmra.mxu1 %v209_v52  ;;  %v569_v61 = vunpack.c.l.b16 %v409_v55  ;;  %v1799_v62 = vunpack.c.l.b16 %v433_v56 }
  0xf4   :  { %v300_v57 = vpop.f32.mrf.mxu0  ;;  %v360_v58 = vpop.f32.mrf.mxu1 }
  0xf5   :  { %v410_v59 = vpack.c.bf16 %v300_v57, %v300_v57  ;;  %v434_v60 = vpack.c.bf16 %v360_v58, %v360_v58 }
  0xf7   :  { %v570_v0 = vunpack.c.l.b16 %v410_v59  ;;  %v1801_v1 = vunpack.c.l.b16 %v434_v60 }
  0xf9   :  { %v1803_v3 = vpack.c.b16 %v570_v0, %v569_v61  ;;  %v859_v4 = vpack.c.b16 %v1801_v1, %v1799_v62 }
  0xfc   :  { %v303_v5 = vpop.f32.mrf.mxu0  ;;  %v363_v6 = vpop.f32.mrf.mxu1 }
  0xfd   :  { %v435_v7 = vpack.c.bf16 %v363_v6, %v363_v6 }
  0xff   :  { %v1807_v12 = vunpack.c.l.b16 %v435_v7 }
 0x104   :  { %v305_v8 = vpop.f32.mrf.mxu0  ;;  %v365_v9 = vpop.f32.mrf.mxu1 }
 0x105   :  { %v436_v11 = vpack.c.bf16 %v365_v9, %v365_v9  ;;  %v412_v6 = vpack.c.bf16 %v305_v8, %v305_v8 }
 0x107   :  { %v1809_v13 = vunpack.c.l.b16 %v436_v11  ;;  %v411_v11 = vpack.c.bf16 %v303_v5, %v303_v5 }
 0x109   :  { %v1125_v14 = vpack.c.b16 %v1809_v13, %v1807_v12  ;;  %v483_v12 = vld [vmem:[#allocation12] sm:$0xff] }
 0x10a   :  { %v467_v13 = vld [vmem:[#allocation10] sm:$0xff] }
 0x10c   :  { %v308_v15 = vpop.f32.mrf.mxu0  ;;  %v368_v16 = vpop.f32.mrf.mxu1 }
 0x10d   :  { %v437_v17 = vpack.c.bf16 %v368_v16, %v368_v16  ;;  %v413_v59 = vpack.c.bf16 %v308_v15, %v308_v15 }
 0x10f   :  { %v1813_v21 = vunpack.c.l.b16 %v437_v17  ;;  %v573_v16 = vunpack.c.l.b16 %v413_v59  ;;  %v572_v17 = vunpack.c.l.b16 %v412_v6  ;;  %v1895_v6 = vld [vmem:[#allocation6 + $0x38] sm:$0xff] }
 0x114   :  { %v310_v18 = vpop.f32.mrf.mxu0  ;;  %v370_v19 = vpop.f32.mrf.mxu1 }
 0x115   :  { %v438_v20 = vpack.c.bf16 %v370_v19, %v370_v19  ;;  %v414_v55 = vpack.c.bf16 %v310_v18, %v310_v18  ;;  %v571_v19 = vunpack.c.l.b16 %v411_v11 }
 0x117   :  { %v1815_v23 = vunpack.c.l.b16 %v438_v20  ;;  %v574_v7 = vunpack.c.l.b16 %v414_v55 }
 0x119   :  { %v1126_v25 = vpack.c.b16 %v1815_v23, %v1813_v21  ;;  %v584_v18 = vpack.c.b16 %v574_v7, %v573_v16 }
 0x11c   :  { %v313_v26 = vpop.f32.mrf.mxu0  ;;  %v373_v27 = vpop.f32.mrf.mxu1 }
 0x11d   :  { %v439_v28 = vpack.c.bf16 %v373_v27, %v373_v27  ;;  %v415_v48 = vpack.c.bf16 %v313_v26, %v313_v26  ;;  %v583_v26 = vpack.c.b16 %v572_v17, %v571_v19 }
 0x11f   :  { %v1819_v34 = vunpack.c.l.b16 %v439_v28  ;;  %v575_v60 = vunpack.c.l.b16 %v415_v48 }
 0x124   :  { %v315_v31 = vpop.f32.mrf.mxu0  ;;  %v375_v32 = vpop.f32.mrf.mxu1 }
 0x125   :  { %v440_v33 = vpack.c.bf16 %v375_v32, %v375_v32  ;;  %v416_v45 = vpack.c.bf16 %v315_v31, %v315_v31  ;;  %v1858_v31 = vld [vmem:[#allocation6] sm:$0xff]  ;;  %v1862_v32 = vld [vmem:[#allocation6 + $0x28] sm:$0xff] }
 0x127   :  { %v1821_v35 = vunpack.c.l.b16 %v440_v33  ;;  %v576_v56 = vunpack.c.l.b16 %v416_v45 }
 0x129   :  { %v1127_v36 = vpack.c.b16 %v1821_v35, %v1819_v34  ;;  %v585_v9 = vpack.c.b16 %v576_v56, %v575_v60 }
 0x12c   :  { %v318_v37 = vpop.f32.mrf.mxu0  ;;  %v378_v38 = vpop.f32.mrf.mxu1 }
 0x12d   :  { %v417_v39 = vpack.c.bf16 %v318_v37, %v318_v37  ;;  %v441_v40 = vpack.c.bf16 %v378_v38, %v378_v38  ;;  %v1881_v38 = vld [vmem:[#allocation6 + $0x10] sm:$0xff] }
 0x12f   :  { %v577_v51 = vunpack.c.l.b16 %v417_v39  ;;  %v1825_v52 = vunpack.c.l.b16 %v441_v40  ;;  %v1883_v39 = vld [vmem:[#allocation6 + $0x30] sm:$0xff] }
 0x134   :  { %v320_v41 = vpop.f32.mrf.mxu0  ;;  %v380_v43 = vpop.f32.mrf.mxu1 }
 0x135   :  { %v418_v46 = vpack.c.bf16 %v320_v41, %v320_v41  ;;  %v442_v47 = vpack.c.bf16 %v380_v43, %v380_v43 }
 0x137   :  { %v578_v53 = vunpack.c.l.b16 %v418_v46  ;;  %v1827_v54 = vunpack.c.l.b16 %v442_v47  ;;  %v1887_v47 = vld [vmem:[#allocation6 + $0x18] sm:$0xff] }
 0x139   :  { %v586_v57 = vpack.c.b16 %v578_v53, %v577_v51  ;;  %v1128_v58 = vpack.c.b16 %v1827_v54, %v1825_v52  ;;  %v469_v52 = vld [vmem:[#allocation10 + $0x10] sm:$0xff] }
 0x13b   :  { %595 = vmatpush.bf16.msrb.mxu1 %v586_v57  ;;  %1462 = vmatpush.bf16.msra.mxu2 %v586_v57 }
 0x13c   :  { %1463 = vmatpush.bf16.msra.mxu3 %v586_v57  ;;  %v1831_v61 = vpop.f32.mrf.mxu0  ;;  %v1833_v0 = vpop.f32.mrf.mxu1 }
 0x13d   :  { %v419_v17 = vpack.c.bf16 %v1831_v61, %v1831_v61 }
 0x13f   :  { %596 = vmatpush.bf16.msrb.mxu1 %v585_v9  ;;  %1464 = vmatpush.bf16.msra.mxu2 %v585_v9 }
 0x140   :  { %1465 = vmatpush.bf16.msra.mxu3 %v585_v9 }
 0x143   :  { %597 = vmatpush.bf16.msrb.mxu1 %v584_v18  ;;  %1466 = vmatpush.bf16.msra.mxu2 %v584_v18 }
 0x144   :  { %1467 = vmatpush.bf16.msra.mxu3 %v584_v18  ;;  %v1835_v15 = vpop.f32.mrf.mxu0  ;;  %v1837_v20 = vpop.f32.mrf.mxu1 }
 0x145   :  { %v420_v18 = vpack.c.bf16 %v1835_v15, %v1835_v15  ;;  %v443_v15 = vpack.c.bf16 %v1833_v0, %v1833_v0 }
 0x147   :  { %598 = vmatpush.bf16.msrb.mxu1 %v583_v26  ;;  %1468 = vmatpush.bf16.msra.mxu2 %v583_v26 }
 0x148   :  { %1469 = vmatpush.bf16.msra.mxu3 %v583_v26 }
 0x14b   :  { %599 = vmatpush.bf16.msrb.mxu1 %v1803_v3  ;;  %1470 = vmatpush.bf16.msra.mxu2 %v1803_v3 }
 0x14c   :  { %1471 = vmatpush.bf16.msra.mxu3 %v1803_v3  ;;  %v1842_v5 = vpop.f32.mrf.mxu0  ;;  %v1844_v8 = vpop.f32.mrf.mxu1  ;;  %v1856_v3 = vld [vmem:[#allocation6 + $0x8] sm:$0xff] }
 0x14d   :  { %v421_v56 = vpack.c.bf16 %v1842_v5, %v1842_v5  ;;  %v445_v19 = vpack.c.bf16 %v1844_v8, %v1844_v8  ;;  %v444_v5 = vpack.c.bf16 %v1837_v20, %v1837_v20  ;;  %v836_v8 = vunpack.c.l.b16 %v419_v17  ;;  %v470_v17 = vld [vmem:[#allocation10 + $0x18] sm:$0xff] }
 0x14f   :  { %600 = vmatpush.bf16.msrb.mxu1 %v1795_v49  ;;  %1472 = vmatpush.bf16.msra.mxu2 %v1795_v49 }
 0x150   :  { %1473 = vmatpush.bf16.msra.mxu3 %v1795_v49  ;;  %v427_v49 = vpack.c.bf16 %v1777_v63, %v1777_v63 }
 0x152   :  { %v844_v62 = vunpack.c.l.b16 %v427_v49 }
 0x153   :  { %601 = vmatpush.bf16.msrb.mxu1 %v1787_v29  ;;  %1474 = vmatpush.bf16.msra.mxu2 %v1787_v29 }
 0x154   :  { %1475 = vmatpush.bf16.msra.mxu3 %v1787_v29  ;;  %v1852_v27 = vpop.f32.mrf.mxu0  ;;  %v1854_v28 = vpop.f32.mrf.mxu1  ;;  %v428_v29 = vpack.c.bf16 %v1779_v2, %v1779_v2 }
 0x155   :  { %v422_v57 = vpack.c.bf16 %v1852_v27, %v1852_v27  ;;  %v446_v59 = vpack.c.bf16 %v1854_v28, %v1854_v28  ;;  %v838_v27 = vunpack.c.l.b16 %v421_v56 }
 0x157   :  { %602 = vmatpush.bf16.msrb.mxu1 %v1781_v10  ;;  %1476 = vmatpush.bf16.msra.mxu2 %v1781_v10  ;;  %v839_v28 = vunpack.c.l.b16 %v422_v57  ;;  %v1120_v49 = vunpack.c.l.b16 %v446_v59 }
 0x158   :  { %1477 = vmatpush.bf16.msra.mxu3 %v1781_v10  ;;  %v845_v10 = vunpack.c.l.b16 %v428_v29  ;;  %v121_v29 = vstv %s1372_s3 }
 0x159   :  { %1498 = vrcp.f32 %v121_v29  ;;  %vm127_vm0 = vweird.f32 %v121_v29 }
 0x15a   :  { %608 = vmatmul.bf16.vlgmr.msra.gmra.mxu2 %v1856_v3  ;;  %603 = vmatmul.bf16.vlgmr.msrb.gmra.mxu1 %v1858_v31  ;;  %v856_v2 = vpack.c.b16 %v845_v10, %v844_v62  ;;  %v837_v10 = vunpack.c.l.b16 %v420_v18  ;;  %v1118_v62 = vunpack.c.l.b16 %v444_v5 }
 0x15b   :  { %868 = vmatpush.bf16.msrb.mxu2 %v859_v4  ;;  %628 = vmatmul.bf16.vlgmr.msra.gmra.mxu3 %v1862_v32 }
 0x15c   :  { %v333_v33 = vpop.f32.mrf.mxu0  ;;  %v393_v37 = vpop.f32.mrf.mxu1 }
 0x15d   :  { %v423_v40 = vpack.c.bf16 %v333_v33, %v333_v33  ;;  %v447_v48 = vpack.c.bf16 %v393_v37, %v393_v37  ;;  %v1119_v37 = vunpack.c.l.b16 %v445_v19 }
 0x15f   :  { %869 = vmatpush.bf16.msrb.mxu2 %v858_v50  ;;  %v840_v60 = vunpack.c.l.b16 %v423_v40  ;;  %v1121_v26 = vunpack.c.l.b16 %v447_v48  ;;  %v1130_v20 = vpack.c.b16 %v1120_v49, %v1119_v37 }
 0x163   :  { %870 = vmatpush.bf16.msrb.mxu2 %v857_v30 }
 0x164   :  { %v335_v1 = vpop.f32.mrf.mxu0  ;;  %v395_v4 = vpop.f32.mrf.mxu1 }
 0x165   :  { %v424_v41 = vpack.c.bf16 %v335_v1, %v335_v1  ;;  %v448_v30 = vpack.c.bf16 %v395_v4, %v395_v4  ;;  %v1499_v1 = vpop.eup %1498  ;;  %v1117_v4 = vunpack.c.l.b16 %v443_v15  ;;  %v487_v15 = vld [vmem:[#allocation12 + $0x20] sm:$0xff] }
 0x166   :  { %vm128_vm1 = vweird.f32 %v1499_v1 }
 0x167   :  { %871 = vmatpush.bf16.msrb.mxu2 %v856_v2  ;;  %v841_v7 = vunpack.c.l.b16 %v424_v41  ;;  %v1122_v9 = vunpack.c.l.b16 %v448_v30  ;;  %v853_v2 = vpack.c.b16 %v839_v28, %v838_v27  ;;  %v133_v41 = vand.u32 2147483648, %v121_v29  ;;  %vm129_vm2 = vmor %vm127_vm0, %vm128_vm1  ;;  %v478_v27 = vld [vmem:[#allocation10 + $0x58] sm:$0xff] }
 0x169   :  { %v854_v33 = vpack.c.b16 %v841_v7, %v840_v60  ;;  %v1131_v61 = vpack.c.b16 %v1122_v9, %v1121_v26  ;;  %v134_v30 = vor.u32 1.1754944e-38, %v133_v41  ;;  %v486_v60 = vld [vmem:[#allocation12 + $0x18] sm:$0xff] }
 0x16a   :  { %613 = vmatmul.bf16.gmra.mxu2 %v1881_v38 }
 0x16b   :  { %633 = vmatmul.bf16.gmra.mxu3 %v1883_v39 }
 0x16c   :  { %v338_v63 = vpop.f32.mrf.mxu0  ;;  %v398_v42 = vpop.f32.mrf.mxu1 }
 0x16d   :  { %v425_v44 = vpack.c.bf16 %v338_v63, %v338_v63  ;;  %v449_v50 = vpack.c.bf16 %v398_v42, %v398_v42  ;;  %v123_v63 = vmul.f32 %v1499_v1, %v121_v29  ;;  %v852_v42 = vpack.c.b16 %v837_v10, %v836_v8  ;;  %v495_v10 = vld [vmem:[#allocation12 + $0x60] sm:$0xff] }
 0x16f   :  { %v842_v43 = vunpack.c.l.b16 %v425_v44  ;;  %v1123_v51 = vunpack.c.l.b16 %v449_v50  ;;  %v1129_v44 = vpack.c.b16 %v1118_v62, %v1117_v4  ;;  %v1450_v50 = vld [vmem:[#allocation6 + $0x20] sm:$0xff]  ;;  %v124_v40 = vsub.f32 1.0, %v123_v63 }
 0x170   :  { %v471_v62 = vld [vmem:[#allocation10 + $0x20] sm:$0xff] }
 0x171   :  { %v125_v0 = vmul.f32 %v1499_v1, %v124_v40  ;;  %v479_v4 = vld [vmem:[#allocation10 + $0x60] sm:$0xff]  ;;  %v488_v40 = vld [vmem:[#allocation12 + $0x28] sm:$0xff] }
 0x174   :  { %v340_v22 = vpop.f32.mrf.mxu0  ;;  %v400_v24 = vpop.f32.mrf.mxu1 }
 0x175   :  { %v426_v45 = vpack.c.bf16 %v340_v22, %v340_v22  ;;  %v450_v46 = vpack.c.bf16 %v400_v24, %v400_v24  ;;  %v126_v22 = vadd.f32 %v1499_v1, %v125_v0  ;;  %v131_v24 = vand.u32 2147483647, %v121_v29 }
 0x177   :  { %v843_v53 = vunpack.c.l.b16 %v426_v45  ;;  %v1124_v55 = vunpack.c.l.b16 %v450_v46  ;;  %vm132_vm3 = vcmp.eq.f32.partialorder %v131_v24, 8.507059e+37  ;;  %v472_v24 = vld [vmem:[#allocation10 + $0x28] sm:$0xff] }
 0x179   :  { %v855_v11 = vpack.c.b16 %v843_v53, %v842_v43  ;;  %v1132_v16 = vpack.c.b16 %v1124_v55, %v1123_v51  ;;  %v130_v43 = vsel %vm129_vm2, %v1499_v1, %v126_v22  ;;  %v496_v22 = vld [vmem:[#allocation12 + $0x68] sm:$0xff] }
 0x17a   :  { %618 = vmatmul.bf16.gmra.mxu2 %v1887_v47  ;;  %v135_v45 = vsel %vm132_vm3, %v134_v30, %v130_v43 }
 0x17b   :  { %872 = vmatpush.bf16.msrb.mxu2 %v855_v11  ;;  %1141 = vmatpush.bf16.msrb.mxu3 %v1132_v16  ;;  %1478 = vpush %v135_v45  ;;  %v494_v16 = vld [vmem:[#allocation12 + $0x58] sm:$0xff] }
 0x17c   :  { %638 = vmatmul.bf16.gmra.mxu3 %v1895_v6 }
 0x17f   :  { %873 = vmatpush.bf16.msrb.mxu2 %v854_v33  ;;  %1142 = vmatpush.bf16.msrb.mxu3 %v1131_v61 }
 0x183   :  { %874 = vmatpush.bf16.msrb.mxu2 %v853_v2  ;;  %1143 = vmatpush.bf16.msrb.mxu3 %v1130_v20 }
 0x187   :  { %875 = vmatpush.bf16.msrb.mxu2 %v852_v42  ;;  %1144 = vmatpush.bf16.msrb.mxu3 %v1129_v44 }
 0x18a   :  { %623 = vmatmul.bf16.gmra.mxu2 %v1450_v50 }
 0x18b   :  { %1145 = vmatpush.bf16.msrb.mxu3 %v1128_v58  ;;  %v484_v58 = vld [vmem:[#allocation12 + $0x8] sm:$0xff] }
 0x18f   :  { %1146 = vmatpush.bf16.msrb.mxu3 %v1127_v36  ;;  %v493_v36 = vld [vmem:[#allocation12 + $0x50] sm:$0xff] }
 0x193   :  { %1147 = vmatpush.bf16.msrb.mxu3 %v1126_v25  ;;  %v485_v25 = vld [vmem:[#allocation12 + $0x10] sm:$0xff] }
 0x197   :  { %1148 = vmatpush.bf16.msrb.mxu3 %v1125_v14 }
 0x19a   :  { %876 = vmatmul.bf16.vlgmr.msrb.gmra.mxu2 %v1858_v31  ;;  %1149 = vmatmul.bf16.vlgmr.msrb.gmra.mxu3 %v1858_v31 }
 0x1aa   :  { %881 = vmatmul.bf16.gmra.mxu2 %v1856_v3  ;;  %1154 = vmatmul.bf16.gmra.mxu3 %v1856_v3 }
 0x1ac   :  { %s1479_s29 = spop %1478 }
 0x1ad   :  { %s137_s30 = smul.f32 %s1479_s29, %s118_s5 }
 0x1af   :  { %v1929_v34 = vstv %s137_s30 }
 0x1ba   :  { %886 = vmatmul.bf16.gmra.mxu2 %v1881_v38  ;;  %1159 = vmatmul.bf16.gmra.mxu3 %v1881_v38  ;;  %v477_v38 = vld [vmem:[#allocation10 + $0x50] sm:$0xff] }
 0x1ca   :  { %891 = vmatmul.bf16.gmra.mxu2 %v1887_v47  ;;  %1164 = vmatmul.bf16.gmra.mxu3 %v1887_v47  ;;  %v468_v47 = vld [vmem:[#allocation10 + $0x8] sm:$0xff] }
 0x1d7   :  { %v604_v14 = vpop.f32.mrf.mxu1 }
 0x1d8   :  { %v605_v21 = vadd.f32 %v604_v14, %v483_v12  ;;  %v480_v12 = vld [vmem:[#allocation10 + $0x68] sm:$0xff] }
 0x1da   :  { %896 = vmatmul.bf16.gmra.mxu2 %v1450_v50  ;;  %1169 = vmatmul.bf16.gmra.mxu3 %v1450_v50  ;;  %v644_v23 = vsub.f32 %v605_v21, %v467_v13 }
 0x1dc   :  { %v661_v35 = vmul.f32 %v1929_v34, %v644_v23 }
 0x1dd   :  { %v609_v54 = vpop.f32.mrf.mxu2 }
 0x1de   :  { %v610_v3 = vadd.f32 %v609_v54, %v485_v25  ;;  %v1932_v31 = vadd.f32 %v661_v35, %v467_v13  ;;  %v629_v46 = vpop.f32.mrf.mxu3  ;;  %v489_v35 = vld [vmem:[#allocation12 + $0x30] sm:$0xff] }
 0x1df   :  { %v606_v48 = vpop.f32.mrf.mxu1  ;;  %v630_v51 = vadd.f32 %v629_v46, %v493_v36  ;;  %v473_v54 = vld [vmem:[#allocation10 + $0x30] sm:$0xff] }
 0x1e0   :  { %v646_v53 = vsub.f32 %v610_v3, %v469_v52  ;;  %v607_v55 = vadd.f32 %v606_v48, %v484_v58  ;;  %693 = vst [vmem:[#allocation13] sm:$0xff] %v1932_v31 }
 0x1e1   :  { %v654_v56 = vsub.f32 %v630_v51, %v477_v38 }
 0x1e2   :  { %v645_v57 = vsub.f32 %v607_v55, %v468_v47  ;;  %v663_v59 = vmul.f32 %v1929_v34, %v646_v53 }
 0x1e3   :  { %v671_v7 = vmul.f32 %v1929_v34, %v654_v56  ;;  %v490_v56 = vld [vmem:[#allocation12 + $0x38] sm:$0xff] }
 0x1e4   :  { %v662_v9 = vmul.f32 %v1929_v34, %v645_v57  ;;  %v1938_v11 = vadd.f32 %v663_v59, %v469_v52 }
 0x1e5   :  { %v611_v18 = vpop.f32.mrf.mxu2  ;;  %v1940_v19 = vadd.f32 %v671_v7, %v477_v38  ;;  %v497_v38 = vld [vmem:[#allocation12 + $0x70] sm:$0xff] }
 0x1e6   :  { %v612_v26 = vadd.f32 %v611_v18, %v486_v60  ;;  %v1942_v5 = vadd.f32 %v662_v9, %v468_v47  ;;  %695 = vst [vmem:[#allocation13 + $0x10] sm:$0xff] %v1938_v11  ;;  %v631_v28 = vpop.f32.mrf.mxu3  ;;  %v481_v47 = vld [vmem:[#allocation10 + $0x70] sm:$0xff]  ;;  %v474_v60 = vld [vmem:[#allocation10 + $0x38] sm:$0xff] }
 0x1e7   :  { %703 = vst [vmem:[#allocation13 + $0x50] sm:$0xff] %v1940_v19  ;;  %v632_v29 = vadd.f32 %v631_v28, %v494_v16  ;;  %v498_v9 = vld [vmem:[#allocation12 + $0x78] sm:$0xff] }
 0x1e8   :  { %v647_v49 = vsub.f32 %v612_v26, %v470_v17  ;;  %694 = vst [vmem:[#allocation13 + $0x8] sm:$0xff] %v1942_v5  ;;  %v482_v18 = vld [vmem:[#allocation10 + $0x78] sm:$0xff] }
 0x1e9   :  { %v655_v33 = vsub.f32 %v632_v29, %v478_v27  ;;  %v1979_v29 = vmul.f32 %v1932_v31, %v1932_v31 }
 0x1ea   :  { %901 = vmatmul.bf16.gmra.mxu2 %v1862_v32  ;;  %1174 = vmatmul.bf16.gmra.mxu3 %v1862_v32  ;;  %v664_v61 = vmul.f32 %v1929_v34, %v647_v49  ;;  %v1983_v49 = vmul.f32 %v1942_v5, %v1942_v5 }
 0x1eb   :  { %v672_v37 = vmul.f32 %v1929_v34, %v655_v33 }
 0x1ec   :  { %v1951_v8 = vadd.f32 %v664_v61, %v470_v17  ;;  %v725_v31 = vadd.f32 %v1983_v49, %v1979_v29 }
 0x1ed   :  { %v614_v2 = vpop.f32.mrf.mxu2  ;;  %v1953_v20 = vadd.f32 %v672_v37, %v478_v27 }
 0x1ee   :  { %v615_v1 = vadd.f32 %v614_v2, %v487_v15  ;;  %696 = vst [vmem:[#allocation13 + $0x18] sm:$0xff] %v1951_v8  ;;  %v634_v63 = vpop.f32.mrf.mxu3  ;;  %v491_v15 = vld [vmem:[#allocation12 + $0x40] sm:$0xff] }
 0x1ef   :  { %704 = vst [vmem:[#allocation13 + $0x58] sm:$0xff] %v1953_v20  ;;  %v635_v32 = vadd.f32 %v634_v63, %v495_v10 }
 0x1f0   :  { %v648_v42 = vsub.f32 %v615_v1, %v471_v62 }
 0x1f1   :  { %v656_v44 = vsub.f32 %v635_v32, %v479_v4 }
 0x1f2   :  { %v665_v50 = vmul.f32 %v1929_v34, %v648_v42 }
 0x1f3   :  { %v673_v0 = vmul.f32 %v1929_v34, %v656_v44 }
 0x1f4   :  { %v1959_v41 = vadd.f32 %v665_v50, %v471_v62  ;;  %v475_v62 = vld [vmem:[#allocation10 + $0x40] sm:$0xff]  ;;  %v492_v50 = vld [vmem:[#allocation12 + $0x48] sm:$0xff] }
 0x1f5   :  { %v616_v30 = vpop.f32.mrf.mxu2  ;;  %v1961_v43 = vadd.f32 %v673_v0, %v479_v4  ;;  %v1995_v4 = vmul.f32 %v1938_v11, %v1938_v11 }
 0x1f6   :  { %697 = vst [vmem:[#allocation13 + $0x20] sm:$0xff] %v1959_v41  ;;  %v617_v45 = vadd.f32 %v616_v30, %v488_v40  ;;  %v636_v13 = vpop.f32.mrf.mxu3  ;;  %v2004_v32 = vmul.f32 %v1959_v41, %v1959_v41 }
 0x1f7   :  { %705 = vst [vmem:[#allocation13 + $0x60] sm:$0xff] %v1961_v43  ;;  %v637_v14 = vadd.f32 %v636_v13, %v496_v22  ;;  %v726_v42 = vadd.f32 %v725_v31, %v1995_v4  ;;  %v476_v22 = vld [vmem:[#allocation10 + $0x48] sm:$0xff] }
 0x1f8   :  { %v649_v21 = vsub.f32 %v617_v45, %v472_v24 }
 0x1f9   :  { %v657_v23 = vsub.f32 %v637_v14, %v480_v12 }
 0x1fa   :  { %v666_v25 = vmul.f32 %v1929_v34, %v649_v21  ;;  %906 = vmatmul.bf16.gmra.mxu2 %v1883_v39  ;;  %1179 = vmatmul.bf16.gmra.mxu3 %v1883_v39 }
 0x1fb   :  { %v674_v36 = vmul.f32 %v1929_v34, %v657_v23 }
 0x1fc   :  { %v682_v52 = vadd.f32 %v666_v25, %v472_v24  ;;  %v804_v25 = vld [vmem:[#allocation12 + $0x80] sm:$0xff] }
 0x1fd   :  { %v619_v58 = vpop.f32.mrf.mxu2  ;;  %v1969_v3 = vadd.f32 %v674_v36, %v480_v12 }
 0x1fe   :  { %698 = vst [vmem:[#allocation13 + $0x28] sm:$0xff] %v682_v52  ;;  %v620_v46 = vadd.f32 %v619_v58, %v489_v35  ;;  %v2009_v11 = vmul.f32 %v682_v52, %v682_v52  ;;  %v1077_v35 = vld [vmem:[#allocation12 + $0x100] sm:$0xff] }
 0x1ff   :  { %706 = vst [vmem:[#allocation13 + $0x68] sm:$0xff] %v1969_v3  ;;  %v639_v48 = vpop.f32.mrf.mxu3 }
 0x200   :  { %v650_v51 = vsub.f32 %v620_v46, %v473_v54  ;;  %v640_v53 = vadd.f32 %v639_v48, %v497_v38  ;;  %v1060_v38 = vld [vmem:[#allocation10 + $0x100] sm:$0xff] }
 0x202   :  { %v667_v55 = vmul.f32 %v1929_v34, %v650_v51  ;;  %v658_v39 = vsub.f32 %v640_v53, %v481_v47 }
 0x204   :  { %v683_v57 = vadd.f32 %v667_v55, %v473_v54  ;;  %v675_v59 = vmul.f32 %v1929_v34, %v658_v39  ;;  %v787_v54 = vld [vmem:[#allocation10 + $0x80] sm:$0xff]  ;;  %v2027_v55 = vmul.f32 %v1940_v19, %v1940_v19 }
 0x205   :  { %v621_v7 = vpop.f32.mrf.mxu2 }
 0x206   :  { %699 = vst [vmem:[#allocation13 + $0x30] sm:$0xff] %v683_v57  ;;  %v622_v16 = vadd.f32 %v621_v7, %v490_v56  ;;  %v1974_v17 = vadd.f32 %v675_v59, %v481_v47  ;;  %v2012_v30 = vmul.f32 %v683_v57, %v683_v57  ;;  %v2032_v59 = vmul.f32 %v1953_v20, %v1953_v20  ;;  %v788_v20 = vld [vmem:[#allocation10 + $0x88] sm:$0xff] }
 0x207   :  { %v641_v26 = vpop.f32.mrf.mxu3 }
 0x208   :  { %v651_v27 = vsub.f32 %v622_v16, %v474_v60  ;;  %707 = vst [vmem:[#allocation13 + $0x70] sm:$0xff] %v1974_v17  ;;  %v642_v28 = vadd.f32 %v641_v26, %v498_v9  ;;  %v805_v16 = vld [vmem:[#allocation12 + $0x88] sm:$0xff] }
 0x20a   :  { %v668_v33 = vmul.f32 %v1929_v34, %v651_v27  ;;  %911 = vmatmul.bf16.gmra.mxu2 %v1895_v6  ;;  %1184 = vmatmul.bf16.gmra.mxu3 %v1895_v6  ;;  %v659_v61 = vsub.f32 %v642_v28, %v482_v18  ;;  %v1999_v6 = vmul.f32 %v1951_v8, %v1951_v8 }
 0x20b   :  { %v2044_v28 = vmul.f32 %v1961_v43, %v1961_v43  ;;  %v2055_v43 = vmul.f32 %v1974_v17, %v1974_v17  ;;  %v789_v17 = vld [vmem:[#allocation10 + $0x90] sm:$0xff] }
 0x20c   :  { %v684_v37 = vadd.f32 %v668_v33, %v474_v60  ;;  %v676_v10 = vmul.f32 %v1929_v34, %v659_v61  ;;  %v727_v40 = vadd.f32 %v726_v42, %v1999_v6  ;;  %v1061_v61 = vld [vmem:[#allocation10 + $0x108] sm:$0xff] }
 0x20d   :  { %v624_v2 = vpop.f32.mrf.mxu2 }
 0x20e   :  { %700 = vst [vmem:[#allocation13 + $0x38] sm:$0xff] %v684_v37  ;;  %v625_v1 = vadd.f32 %v624_v2, %v491_v15  ;;  %v1991_v5 = vadd.f32 %v676_v10, %v482_v18  ;;  %v728_v24 = vadd.f32 %v727_v40, %v2004_v32  ;;  %v2015_v12 = vmul.f32 %v684_v37, %v684_v37  ;;  %v1078_v18 = vld [vmem:[#allocation12 + $0x108] sm:$0xff]  ;;  %v1079_v40 = vld [vmem:[#allocation12 + $0x110] sm:$0xff] }
 0x210   :  { %v652_v63 = vsub.f32 %v625_v1, %v475_v62  ;;  %708 = vst [vmem:[#allocation13 + $0x78] sm:$0xff] %v1991_v5  ;;  %v729_v41 = vadd.f32 %v728_v24, %v2009_v11 }
 0x212   :  { %v669_v44 = vmul.f32 %v1929_v34, %v652_v63  ;;  %v730_v14 = vadd.f32 %v729_v41, %v2012_v30 }
 0x214   :  { %v685_v0 = vadd.f32 %v669_v44, %v475_v62  ;;  %v731_v36 = vadd.f32 %v730_v14, %v2015_v12  ;;  %v2050_v62 = vmul.f32 %v1969_v3, %v1969_v3  ;;  %v2062_v3 = vmul.f32 %v1991_v5, %v1991_v5 }
 0x215   :  { %v626_v8 = vpop.f32.mrf.mxu2 }
 0x216   :  { %701 = vst [vmem:[#allocation13 + $0x40] sm:$0xff] %v685_v0  ;;  %v627_v45 = vadd.f32 %v626_v8, %v492_v50  ;;  %v2018_v21 = vmul.f32 %v685_v0, %v685_v0  ;;  %v806_v50 = vld [vmem:[#allocation12 + $0x90] sm:$0xff] }
 0x218   :  { %v653_v13 = vsub.f32 %v627_v45, %v476_v22  ;;  %v732_v47 = vadd.f32 %v731_v36, %v2018_v21  ;;  %v1062_v45 = vld [vmem:[#allocation10 + $0x110] sm:$0xff] }
 0x21a   :  { %v670_v23 = vmul.f32 %v1929_v34, %v653_v13 }
 0x21c   :  { %v686_v52 = vadd.f32 %v670_v23, %v476_v22 }
 0x21d   :  { %v877_v58 = vpop.f32.mrf.mxu2  ;;  %v1150_v46 = vpop.f32.mrf.mxu3 }
 0x21e   :  { %702 = vst [vmem:[#allocation13 + $0x48] sm:$0xff] %v686_v52  ;;  %v2023_v48 = vmul.f32 %v686_v52, %v686_v52  ;;  %v878_v51 = vadd.f32 %v877_v58, %v804_v25  ;;  %v1151_v53 = vadd.f32 %v1150_v46, %v1077_v35  ;;  %v807_v52 = vld [vmem:[#allocation12 + $0x98] sm:$0xff] }
 0x21f   :  { %v790_v46 = vld [vmem:[#allocation10 + $0x98] sm:$0xff] }
 0x220   :  { %v733_v39 = vadd.f32 %v732_v47, %v2023_v48  ;;  %v917_v56 = vsub.f32 %v878_v51, %v787_v54  ;;  %v1190_v57 = vsub.f32 %v1151_v53, %v1060_v38  ;;  %v1063_v51 = vld [vmem:[#allocation10 + $0x118] sm:$0xff] }
 0x222   :  { %v933_v60 = vmul.f32 %v917_v56, %v1929_v34  ;;  %v1206_v7 = vmul.f32 %v1190_v57, %v1929_v34  ;;  %v734_v9 = vadd.f32 %v733_v39, %v2027_v55 }
 0x224   :  { %v2037_v26 = vadd.f32 %v933_v60, %v787_v54  ;;  %v2039_v19 = vadd.f32 %v1206_v7, %v1060_v38  ;;  %v735_v27 = vadd.f32 %v734_v9, %v2032_v59  ;;  %v1080_v54 = vld [vmem:[#allocation12 + $0x118] sm:$0xff] }
 0x225   :  { %v879_v33 = vpop.f32.mrf.mxu2  ;;  %v1152_v15 = vpop.f32.mrf.mxu3 }
 0x226   :  { %966 = vst [vmem:[#allocation13 + $0x80] sm:$0xff] %v2037_v26  ;;  %v880_v37 = vadd.f32 %v879_v33, %v805_v16  ;;  %v1153_v10 = vadd.f32 %v1152_v15, %v1078_v18  ;;  %v736_v2 = vadd.f32 %v735_v27, %v2044_v28  ;;  %v808_v16 = vld [vmem:[#allocation12 + $0xa0] sm:$0xff] }
 0x227   :  { %1239 = vst [vmem:[#allocation13 + $0x100] sm:$0xff] %v2039_v19  ;;  %v1081_v18 = vld [vmem:[#allocation12 + $0x120] sm:$0xff] }
 0x228   :  { %v918_v31 = vsub.f32 %v880_v37, %v788_v20  ;;  %v1191_v1 = vsub.f32 %v1153_v10, %v1061_v61  ;;  %v737_v63 = vadd.f32 %v736_v2, %v2050_v62  ;;  %v791_v33 = vld [vmem:[#allocation10 + $0xa0] sm:$0xff] }
 0x229   :  { %v1064_v15 = vld [vmem:[#allocation10 + $0x120] sm:$0xff] }
 0x22a   :  { %v934_v42 = vmul.f32 %v918_v31, %v1929_v34  ;;  %v1207_v44 = vmul.f32 %v1191_v1, %v1929_v34  ;;  %v738_v0 = vadd.f32 %v737_v63, %v2055_v43 }
 0x22c   :  { %v2065_v22 = vadd.f32 %v934_v42, %v788_v20  ;;  %v2067_v8 = vadd.f32 %v1207_v44, %v1061_v61  ;;  %v739_v13 = vadd.f32 %v738_v0, %v2062_v3  ;;  %v809_v44 = vld [vmem:[#allocation12 + $0xa8] sm:$0xff] }
 0x22d   :  { %v882_v24 = vpop.f32.mrf.mxu2  ;;  %v1155_v41 = vpop.f32.mrf.mxu3 }
 0x22e   :  { %967 = vst [vmem:[#allocation13 + $0x88] sm:$0xff] %v2065_v22  ;;  %v883_v14 = vadd.f32 %v882_v24, %v806_v50  ;;  %v1156_v23 = vadd.f32 %v1155_v41, %v1079_v40  ;;  %740 = vadd.xlane.f32.xlu0 %v739_v13  ;;  %v1082_v50 = vld [vmem:[#allocation12 + $0x128] sm:$0xff] }
 0x22f   :  { %1240 = vst [vmem:[#allocation13 + $0x108] sm:$0xff] %v2067_v8 }
 0x230   :  { %v919_v5 = vsub.f32 %v883_v14, %v789_v17  ;;  %v1192_v25 = vsub.f32 %v1156_v23, %v1062_v45 }
 0x232   :  { %v935_v35 = vmul.f32 %v919_v5, %v1929_v34  ;;  %v1208_v36 = vmul.f32 %v1192_v25, %v1929_v34 }
 0x234   :  { %v2074_v58 = vadd.f32 %v935_v35, %v789_v17  ;;  %v2076_v38 = vadd.f32 %v1208_v36, %v1062_v45  ;;  %v792_v17 = vld [vmem:[#allocation10 + $0xa8] sm:$0xff]  ;;  %v810_v36 = vld [vmem:[#allocation12 + $0xb0] sm:$0xff] }
 0x235   :  { %v884_v47 = vpop.f32.mrf.mxu2  ;;  %v1157_v53 = vpop.f32.mrf.mxu3  ;;  %v1065_v45 = vld [vmem:[#allocation10 + $0x128] sm:$0xff] }
 0x236   :  { %968 = vst [vmem:[#allocation13 + $0x90] sm:$0xff] %v2074_v58  ;;  %v885_v39 = vadd.f32 %v884_v47, %v807_v52  ;;  %v1158_v56 = vadd.f32 %v1157_v53, %v1080_v54  ;;  %v1083_v52 = vld [vmem:[#allocation12 + $0x130] sm:$0xff] }
 0x237   :  { %1241 = vst [vmem:[#allocation13 + $0x110] sm:$0xff] %v2076_v38  ;;  %v793_v47 = vld [vmem:[#allocation10 + $0xb0] sm:$0xff] }
 0x238   :  { %v920_v57 = vsub.f32 %v885_v39, %v790_v46  ;;  %v1193_v60 = vsub.f32 %v1158_v56, %v1063_v51  ;;  %v1066_v53 = vld [vmem:[#allocation10 + $0x130] sm:$0xff] }
 0x23a   :  { %v936_v7 = vmul.f32 %v920_v57, %v1929_v34  ;;  %v1209_v9 = vmul.f32 %v1193_v60, %v1929_v34 }
 0x23c   :  { %v2082_v27 = vadd.f32 %v936_v7, %v790_v46  ;;  %v2084_v20 = vadd.f32 %v1209_v9, %v1063_v51 }
 0x23d   :  { %v887_v61 = vpop.f32.mrf.mxu2  ;;  %v1160_v37 = vpop.f32.mrf.mxu3 }
 0x23e   :  { %969 = vst [vmem:[#allocation13 + $0x98] sm:$0xff] %v2082_v27  ;;  %v888_v10 = vadd.f32 %v887_v61, %v808_v16  ;;  %v1161_v2 = vadd.f32 %v1160_v37, %v1081_v18  ;;  %v811_v18 = vld [vmem:[#allocation12 + $0xb8] sm:$0xff] }
 0x23f   :  { %1242 = vst [vmem:[#allocation13 + $0x118] sm:$0xff] %v2084_v20  ;;  %v794_v37 = vld [vmem:[#allocation10 + $0xb8] sm:$0xff] }
 0x240   :  { %v921_v31 = vsub.f32 %v888_v10, %v791_v33  ;;  %v1194_v1 = vsub.f32 %v1161_v2, %v1064_v15  ;;  %v1067_v2 = vld [vmem:[#allocation10 + $0x138] sm:$0xff] }
 0x242   :  { %v937_v63 = vmul.f32 %v921_v31, %v1929_v34  ;;  %v1210_v42 = vmul.f32 %v1194_v1, %v1929_v34 }
 0x244   :  { %v2090_v40 = vadd.f32 %v937_v63, %v791_v33  ;;  %v2092_v0 = vadd.f32 %v1210_v42, %v1064_v15  ;;  %v1084_v33 = vld [vmem:[#allocation12 + $0x138] sm:$0xff] }
 0x245   :  { %v889_v24 = vpop.f32.mrf.mxu2  ;;  %v1162_v41 = vpop.f32.mrf.mxu3 }
 0x246   :  { %970 = vst [vmem:[#allocation13 + $0xa0] sm:$0xff] %v2090_v40  ;;  %v890_v13 = vadd.f32 %v889_v24, %v809_v44  ;;  %v1163_v14 = vadd.f32 %v1162_v41, %v1082_v50  ;;  %v812_v24 = vld [vmem:[#allocation12 + $0xc0] sm:$0xff] }
 0x247   :  { %1243 = vst [vmem:[#allocation13 + $0x120] sm:$0xff] %v2092_v0 }
 0x248   :  { %v922_v23 = vsub.f32 %v890_v13, %v792_v17  ;;  %v1195_v5 = vsub.f32 %v1163_v14, %v1065_v45  ;;  %v795_v14 = vld [vmem:[#allocation10 + $0xc0] sm:$0xff] }
 0x24a   :  { %v938_v25 = vmul.f32 %v922_v23, %v1929_v34  ;;  %v1211_v35 = vmul.f32 %v1195_v5, %v1929_v34  ;;  %v1068_v5 = vld [vmem:[#allocation10 + $0x140] sm:$0xff] }
 0x24c   :  { %v2098_v54 = vadd.f32 %v938_v25, %v792_v17  ;;  %v2100_v46 = vadd.f32 %v1211_v35, %v1065_v45  ;;  %v1085_v45 = vld [vmem:[#allocation12 + $0x140] sm:$0xff] }
 0x24d   :  { %v892_v51 = vpop.f32.mrf.mxu2  ;;  %v1165_v39 = vpop.f32.mrf.mxu3 }
 0x24e   :  { %971 = vst [vmem:[#allocation13 + $0xa8] sm:$0xff] %v2098_v54  ;;  %v893_v56 = vadd.f32 %v892_v51, %v810_v36  ;;  %v1166_v57 = vadd.f32 %v1165_v39, %v1083_v52  ;;  %v813_v39 = vld [vmem:[#allocation12 + $0xc8] sm:$0xff] }
 0x24f   :  { %1244 = vst [vmem:[#allocation13 + $0x128] sm:$0xff] %v2100_v46 }
 0x250   :  { %v923_v60 = vsub.f32 %v893_v56, %v793_v47  ;;  %v1196_v7 = vsub.f32 %v1166_v57, %v1066_v53  ;;  %v1086_v56 = vld [vmem:[#allocation12 + $0x148] sm:$0xff] }
 0x252   :  { %v939_v9 = vmul.f32 %v923_v60, %v1929_v34  ;;  %v1212_v16 = vmul.f32 %v1196_v7, %v1929_v34  ;;  %v796_v7 = vld [vmem:[#allocation10 + $0xc8] sm:$0xff] }
 0x254   :  { %v2106_v61 = vadd.f32 %v939_v9, %v793_v47  ;;  %v2108_v15 = vadd.f32 %v1212_v16, %v1066_v53  ;;  %v1069_v16 = vld [vmem:[#allocation10 + $0x148] sm:$0xff] }
 0x255   :  { %v894_v10 = vpop.f32.mrf.mxu2  ;;  %v1167_v31 = vpop.f32.mrf.mxu3 }
 0x256   :  { %972 = vst [vmem:[#allocation13 + $0xb0] sm:$0xff] %v2106_v61  ;;  %v895_v1 = vadd.f32 %v894_v10, %v811_v18  ;;  %v1168_v63 = vadd.f32 %v1167_v31, %v1084_v33 }
 0x257   :  { %1245 = vst [vmem:[#allocation13 + $0x130] sm:$0xff] %v2108_v15 }
 0x258   :  { %v924_v42 = vsub.f32 %v895_v1, %v794_v37  ;;  %v1197_v44 = vsub.f32 %v1168_v63, %v1067_v2  ;;  %v814_v63 = vld [vmem:[#allocation12 + $0xd0] sm:$0xff] }
 0x25a   :  { %v940_v50 = vmul.f32 %v924_v42, %v1929_v34  ;;  %v1213_v17 = vmul.f32 %v1197_v44, %v1929_v34  ;;  %v1087_v42 = vld [vmem:[#allocation12 + $0x150] sm:$0xff] }
 0x25c   :  { %v2114_v41 = vadd.f32 %v940_v50, %v794_v37  ;;  %v2116_v13 = vadd.f32 %v1213_v17, %v1067_v2  ;;  %v797_v17 = vld [vmem:[#allocation10 + $0xd0] sm:$0xff] }
 0x25d   :  { %v897_v23 = vpop.f32.mrf.mxu2  ;;  %v1170_v25 = vpop.f32.mrf.mxu3 }
 0x25e   :  { %973 = vst [vmem:[#allocation13 + $0xb8] sm:$0xff] %v2114_v41  ;;  %v898_v35 = vadd.f32 %v897_v23, %v812_v24  ;;  %v1171_v36 = vadd.f32 %v1170_v25, %v1085_v45  ;;  %v1070_v45 = vld [vmem:[#allocation10 + $0x150] sm:$0xff] }
 0x25f   :  { %1246 = vst [vmem:[#allocation13 + $0x138] sm:$0xff] %v2116_v13 }
 0x260   :  { %v925_v52 = vsub.f32 %v898_v35, %v795_v14  ;;  %v1198_v47 = vsub.f32 %v1171_v36, %v1068_v5 }
 0x262   :  { %v941_v51 = vmul.f32 %v925_v52, %v1929_v34  ;;  %v1214_v53 = vmul.f32 %v1198_v47, %v1929_v34  ;;  %v815_v47 = vld [vmem:[#allocation12 + $0xd8] sm:$0xff] }
 0x264   :  { %v2122_v57 = vadd.f32 %v941_v51, %v795_v14  ;;  %v2124_v60 = vadd.f32 %v1214_v53, %v1068_v5  ;;  %v1088_v51 = vld [vmem:[#allocation12 + $0x158] sm:$0xff] }
 0x265   :  { %v899_v9 = vpop.f32.mrf.mxu2  ;;  %v1172_v18 = vpop.f32.mrf.mxu3 }
 0x266   :  { %974 = vst [vmem:[#allocation13 + $0xc0] sm:$0xff] %v2122_v57  ;;  %v900_v33 = vadd.f32 %v899_v9, %v813_v39  ;;  %v1173_v37 = vadd.f32 %v1172_v18, %v1086_v56  ;;  %v798_v56 = vld [vmem:[#allocation10 + $0xd8] sm:$0xff] }
 0x267   :  { %1247 = vst [vmem:[#allocation13 + $0x140] sm:$0xff] %v2124_v60  ;;  %v1071_v9 = vld [vmem:[#allocation10 + $0x158] sm:$0xff] }
 0x268   :  { %v926_v10 = vsub.f32 %v900_v33, %v796_v7  ;;  %v1199_v2 = vsub.f32 %v1173_v37, %v1069_v16 }
 0x26a   :  { %v942_v31 = vmul.f32 %v926_v10, %v1929_v34  ;;  %v1215_v1 = vmul.f32 %v1199_v2, %v1929_v34 }
 0x26c   :  { %v2130_v44 = vadd.f32 %v942_v31, %v796_v7  ;;  %v2132_v50 = vadd.f32 %v1215_v1, %v1069_v16  ;;  %v816_v1 = vld [vmem:[#allocation12 + $0xe0] sm:$0xff] }
 0x26d   :  { %v902_v24 = vpop.f32.mrf.mxu2  ;;  %v1175_v14 = vpop.f32.mrf.mxu3 }
 0x26e   :  { %975 = vst [vmem:[#allocation13 + $0xc8] sm:$0xff] %v2130_v44  ;;  %v903_v23 = vadd.f32 %v902_v24, %v814_v63  ;;  %v1176_v5 = vadd.f32 %v1175_v14, %v1087_v42  ;;  %v1089_v63 = vld [vmem:[#allocation12 + $0x160] sm:$0xff] }
 0x26f   :  { %1248 = vst [vmem:[#allocation13 + $0x148] sm:$0xff] %v2132_v50  ;;  %v799_v24 = vld [vmem:[#allocation10 + $0xe0] sm:$0xff] }
 0x270   :  { %v927_v25 = vsub.f32 %v903_v23, %v797_v17  ;;  %v1200_v35 = vsub.f32 %v1176_v5, %v1070_v45  ;;  %v1072_v14 = vld [vmem:[#allocation10 + $0x160] sm:$0xff] }
 0x272   :  { %v943_v36 = vmul.f32 %v927_v25, %v1929_v34  ;;  %v1216_v52 = vmul.f32 %v1200_v35, %v1929_v34  ;;  %v2153_v35 = vmul.f32 %v2065_v22, %v2065_v22  ;;  %v2170_v22 = vmul.f32 %v2074_v58, %v2074_v58 }
 0x273   :  { %v2188_v58 = vmul.f32 %v2084_v20, %v2084_v20  ;;  %v800_v20 = vld [vmem:[#allocation10 + $0xe8] sm:$0xff] }
 0x274   :  { %v2138_v53 = vadd.f32 %v943_v36, %v797_v17  ;;  %v2140_v39 = vadd.f32 %v1216_v52, %v1070_v45  ;;  %v2157_v36 = vmul.f32 %v2067_v8, %v2067_v8  ;;  %v2174_v8 = vmul.f32 %v2076_v38, %v2076_v38  ;;  %v817_v38 = vld [vmem:[#allocation12 + $0xe8] sm:$0xff] }
 0x275   :  { %v904_v7 = vpop.f32.mrf.mxu2  ;;  %v1177_v16 = vpop.f32.mrf.mxu3 }
 0x276   :  { %976 = vst [vmem:[#allocation13 + $0xd0] sm:$0xff] %v2138_v53  ;;  %v905_v18 = vadd.f32 %v904_v7, %v815_v47  ;;  %v1178_v33 = vadd.f32 %v1177_v16, %v1088_v51  ;;  %v2162_v51 = vmul.f32 %v2037_v26, %v2037_v26 }
 0x277   :  { %1249 = vst [vmem:[#allocation13 + $0x150] sm:$0xff] %v2140_v39 }
 0x278   :  { %v928_v37 = vsub.f32 %v905_v18, %v798_v56  ;;  %v1201_v10 = vsub.f32 %v1178_v33, %v1071_v9  ;;  %v998_v26 = vadd.f32 %v2153_v35, %v2162_v51  ;;  %v1090_v18 = vld [vmem:[#allocation12 + $0x168] sm:$0xff] }
 0x27a   :  { %v944_v2 = vmul.f32 %v928_v37, %v1929_v34  ;;  %v1217_v31 = vmul.f32 %v1201_v10, %v1929_v34  ;;  %v999_v10 = vadd.f32 %v998_v26, %v2170_v22 }
 0x27c   :  { %v2146_v42 = vadd.f32 %v944_v2, %v798_v56  ;;  %v2148_v17 = vadd.f32 %v1217_v31, %v1071_v9  ;;  %v2166_v56 = vmul.f32 %v2039_v19, %v2039_v19  ;;  %v2184_v19 = vmul.f32 %v2082_v27, %v2082_v27 }
 0x27d   :  { %v907_v45 = vpop.f32.mrf.mxu2  ;;  %v1180_v23 = vpop.f32.mrf.mxu3  ;;  %v2198_v31 = vmul.f32 %v2090_v40, %v2090_v40  ;;  %v2202_v27 = vmul.f32 %v2092_v0, %v2092_v0  ;;  %v2209_v40 = vmul.f32 %v2098_v54, %v2098_v54  ;;  %v2213_v0 = vmul.f32 %v2100_v46, %v2100_v46 }
 0x27e   :  { %977 = vst [vmem:[#allocation13 + $0xd8] sm:$0xff] %v2146_v42  ;;  %v908_v5 = vadd.f32 %v907_v45, %v816_v1  ;;  %v1181_v25 = vadd.f32 %v1180_v23, %v1089_v63  ;;  %v1271_v16 = vadd.f32 %v2157_v36, %v2166_v56  ;;  %v1073_v63 = vld [vmem:[#allocation10 + $0x168] sm:$0xff]  ;;  %v1000_v23 = vadd.f32 %v999_v10, %v2184_v19  ;;  %v818_v10 = vld [vmem:[#allocation12 + $0xf0] sm:$0xff] }
 0x27f   :  { %1250 = vst [vmem:[#allocation13 + $0x158] sm:$0xff] %v2148_v17  ;;  %v2224_v54 = vmul.f32 %v2108_v15, %v2108_v15 }
 0x280   :  { %v929_v52 = vsub.f32 %v908_v5, %v799_v24  ;;  %v1202_v47 = vsub.f32 %v1181_v25, %v1072_v14  ;;  %v1272_v2 = vadd.f32 %v1271_v16, %v2174_v8 }
 0x282   :  { %v945_v7 = vmul.f32 %v929_v52, %v1929_v34  ;;  %v1218_v9 = vmul.f32 %v1202_v47, %v1929_v34  ;;  %v1273_v5 = vadd.f32 %v1272_v2, %v2188_v58  ;;  %v1001_v47 = vadd.f32 %v1000_v23, %v2198_v31  ;;  %v1091_v2 = vld [vmem:[#allocation12 + $0x170] sm:$0xff] }
 0x283   :  { %v801_v23 = vld [vmem:[#allocation10 + $0xf0] sm:$0xff] }
 0x284   :  { %v2190_v33 = vadd.f32 %v945_v7, %v799_v24  ;;  %v2192_v37 = vadd.f32 %v1218_v9, %v1072_v14  ;;  %v1274_v7 = vadd.f32 %v1273_v5, %v2202_v27  ;;  %v2220_v9 = vmul.f32 %v2106_v61, %v2106_v61 }
 0x285   :  { %v909_v1 = vpop.f32.mrf.mxu2  ;;  %v1182_v45 = vpop.f32.mrf.mxu3  ;;  %v1002_v16 = vadd.f32 %v1001_v47, %v2209_v40  ;;  %v2236_v61 = vmul.f32 %v2116_v13, %v2116_v13  ;;  %v1074_v13 = vld [vmem:[#allocation10 + $0x170] sm:$0xff] }
 0x286   :  { %978 = vst [vmem:[#allocation13 + $0xe0] sm:$0xff] %v2190_v33  ;;  %v910_v24 = vadd.f32 %v909_v1, %v817_v38  ;;  %v1183_v14 = vadd.f32 %v1182_v45, %v1090_v18  ;;  %v1275_v38 = vadd.f32 %v1274_v7, %v2213_v0  ;;  %v2232_v18 = vmul.f32 %v2114_v41, %v2114_v41 }
 0x287   :  { %1251 = vst [vmem:[#allocation13 + $0x160] sm:$0xff] %v2192_v37  ;;  %v1003_v45 = vadd.f32 %v1002_v16, %v2220_v9  ;;  %v2246_v41 = vmul.f32 %v2124_v60, %v2124_v60  ;;  %v2252_v7 = vmul.f32 %v2130_v44, %v2130_v44 }
 0x288   :  { %v930_v25 = vsub.f32 %v910_v24, %v800_v20  ;;  %v1203_v52 = vsub.f32 %v1183_v14, %v1073_v63  ;;  %v1276_v24 = vadd.f32 %v1275_v38, %v2224_v54  ;;  %v2242_v14 = vmul.f32 %v2122_v57, %v2122_v57 }
 0x289   :  { %v2256_v57 = vmul.f32 %v2132_v50, %v2132_v50  ;;  %v2262_v38 = vmul.f32 %v2138_v53, %v2138_v53  ;;  %v2278_v53 = vmul.f32 %v2148_v17, %v2148_v17  ;;  %v1075_v17 = vld [vmem:[#allocation10 + $0x178] sm:$0xff] }
 0x28a   :  { %v946_v26 = vmul.f32 %v930_v25, %v1929_v34  ;;  %v1219_v46 = vmul.f32 %v1203_v52, %v1929_v34  ;;  %v1277_v47 = vadd.f32 %v1276_v24, %v2236_v61  ;;  %v2274_v24 = vmul.f32 %v2146_v42, %v2146_v42 }
 0x28b   :  { %2389 = vst [vmem:[#allocation22_spill] sm:$0xff] %v2256_v57  ;;  %v2288_v42 = vmul.f32 %v2192_v37, %v2192_v37 }
 0x28c   :  { %v962_v15 = vadd.f32 %v946_v26, %v800_v20  ;;  %v1235_v1 = vadd.f32 %v1219_v46, %v1073_v63  ;;  %v1004_v63 = vadd.f32 %v1003_v45, %v2232_v18  ;;  %v1278_v16 = vadd.f32 %v1277_v47, %v2246_v41 }
 0x28d   :  { %v912_v5 = vpop.f32.mrf.mxu2  ;;  %v1185_v25 = vpop.f32.mrf.mxu3  ;;  %v2284_v47 = vmul.f32 %v2190_v33, %v2190_v33 }
 0x28e   :  { %979 = vst [vmem:[#allocation13 + $0xe8] sm:$0xff] %v962_v15  ;;  %v913_v52 = vadd.f32 %v912_v5, %v818_v10  ;;  %v1186_v20 = vadd.f32 %v1185_v25, %v1091_v2  ;;  %v1005_v46 = vadd.f32 %v1004_v63, %v2242_v14  ;;  %v2266_v10 = vmul.f32 %v2140_v39, %v2140_v39  ;;  %v819_v5 = vld [vmem:[#allocation12 + $0xf8] sm:$0xff] }
 0x28f   :  { %1252 = vst [vmem:[#allocation13 + $0x168] sm:$0xff] %v1235_v1  ;;  %v1279_v45 = vadd.f32 %v1278_v16, %v2256_v57  ;;  %v1092_v25 = vld [vmem:[#allocation12 + $0x178] sm:$0xff] }
 0x290   :  { %v931_v60 = vsub.f32 %v913_v52, %v801_v23  ;;  %v1204_v26 = vsub.f32 %v1186_v20, %v1074_v13  ;;  %2390 = vst [vmem:[#allocation23_spill] sm:$0xff] %v2266_v10  ;;  %v1006_v2 = vadd.f32 %v1005_v46, %v2252_v7 }
 0x291   :  { %v1280_v63 = vadd.f32 %v1279_v45, %v2266_v10  ;;  %v2294_v45 = vmul.f32 %v1235_v1, %v1235_v1 }
 0x292   :  { %v947_v44 = vmul.f32 %v931_v60, %v1929_v34  ;;  %v1220_v50 = vmul.f32 %v1204_v26, %v1929_v34  ;;  %v1007_v20 = vadd.f32 %v1006_v2, %v2262_v38  ;;  %v802_v60 = vld [vmem:[#allocation10 + $0xf8] sm:$0xff] }
 0x294   :  { %v963_v39 = vadd.f32 %v947_v44, %v801_v23  ;;  %v1236_v52 = vadd.f32 %v1220_v50, %v1074_v13  ;;  %v1008_v13 = vadd.f32 %v1007_v20, %v2274_v24  ;;  %v1281_v44 = vadd.f32 %v1280_v63, %v2278_v53 }
 0x295   :  { %v914_v26 = vpop.f32.mrf.mxu2  ;;  %v1187_v46 = vpop.f32.mrf.mxu3  ;;  %v2292_v50 = vmul.f32 %v962_v15, %v962_v15 }
 0x296   :  { %980 = vst [vmem:[#allocation13 + $0xf0] sm:$0xff] %v963_v39  ;;  %v915_v16 = vadd.f32 %v914_v26, %v819_v5  ;;  %v1188_v23 = vadd.f32 %v1187_v46, %v1092_v25  ;;  %v1282_v37 = vadd.f32 %v1281_v44, %v2288_v42  ;;  %v1009_v10 = vadd.f32 %v1008_v13, %v2284_v47 }
 0x297   :  { %1253 = vst [vmem:[#allocation13 + $0x170] sm:$0xff] %v1236_v52  ;;  %v2300_v25 = vmul.f32 %v1236_v52, %v1236_v52  ;;  %v2302_v20 = vmul.f32 %v963_v39, %v963_v39 }
 0x298   :  { %v932_v33 = vsub.f32 %v915_v16, %v802_v60  ;;  %v1205_v2 = vsub.f32 %v1188_v23, %v1075_v17  ;;  %v1283_v15 = vadd.f32 %v1282_v37, %v2294_v45  ;;  %v1010_v46 = vadd.f32 %v1009_v10, %v2292_v50 }
 0x29a   :  { %v948_v57 = vmul.f32 %v932_v33, %v1929_v34  ;;  %v1221_v5 = vmul.f32 %v1205_v2, %v1929_v34  ;;  %v1284_v16 = vadd.f32 %v1283_v15, %v2300_v25  ;;  %v1011_v13 = vadd.f32 %v1010_v46, %v2302_v20 }
 0x29b   :  { %v2314_v2 = vstv %s1373_s9 }
 0x29c   :  { %v964_v26 = vadd.f32 %v948_v57, %v802_v60  ;;  %v1237_v63 = vadd.f32 %v1221_v5, %v1075_v17 }
 0x29e   :  { %981 = vst [vmem:[#allocation13 + $0xf8] sm:$0xff] %v964_v26  ;;  %v2306_v1 = vmul.f32 %v1237_v63, %v1237_v63  ;;  %v2309_v23 = vmul.f32 %v964_v26, %v964_v26 }
 0x29f   :  { %1254 = vst [vmem:[#allocation13 + $0x178] sm:$0xff] %v1237_v63 }
 0x2a0   :  { %v1285_v34 = vadd.f32 %v1284_v16, %v2306_v1  ;;  %v1012_v39 = vadd.f32 %v1011_v13, %v2309_v23  ;;  %1344 = dma.vmem_to_hbm [thread:$0]  %s1337_s12, 6144, %s1339_s15, [#allocation4], %s1702_s2, %s1702_s2, %s1703_s16  }
 0x2a1   :  { %v741_v57 = vpop.xlane.xlu0 %740 }
 0x2a2   :  { %1286 = vadd.xlane.f32.xlu1 %v1285_v34  ;;  %1013 = vadd.xlane.f32.xlu0 %v1012_v39  ;;  %v742_v52 = vrot.slane %v741_v57, 4 }
 0x2a4   :  { %v743_v60 = vadd.f32 %v742_v52, %v741_v57 }
 0x2a6   :  { %v744_v10 = vrot.slane %v743_v60, 2 }
 0x2a8   :  { %v745_v17 = vadd.f32 %v744_v10, %v743_v60 }
 0x2aa   :  { %v746_v44 = vrot.slane %v745_v17, 1 }
 0x2ac   :  { %v747_v33 = vadd.f32 %v746_v44, %v745_v17 }
 0x2ae   :  { %1480 = vpush %v747_v33 }
 0x2df   :  { %s1481_s10 = spop %1480 }
 0x2e0   :  { %v749_v37 = vstv %s1481_s10 }
 0x2e1   :  { %v751_v5 = vmul.f32 %v2314_v2, %v749_v37 }
 0x2e3   :  { %v752_v26 = vadd.f32 1.0, %v751_v5 }
 0x2e5   :  { %1500 = vrcp.f32 %v752_v26 }
 0x2eb   :  { %v1501_v63 = vpop.eup %1500 }
 0x2ec   :  { %v754_v15 = vmul.f32 %v1501_v63, %v1979_v29  ;;  %v755_v46 = vmul.f32 %v1501_v63, %v1983_v49  ;;  %v756_v16 = vmul.f32 %v1501_v63, %v1995_v4  ;;  %v757_v13 = vmul.f32 %v1501_v63, %v1999_v6 }
 0x2ed   :  { %v758_v34 = vmul.f32 %v1501_v63, %v2004_v32  ;;  %v759_v39 = vmul.f32 %v1501_v63, %v2009_v11  ;;  %v760_v57 = vmul.f32 %v1501_v63, %v2012_v30  ;;  %v761_v52 = vmul.f32 %v1501_v63, %v2015_v12 }
 0x2ee   :  { %770 = vst [vmem:[#allocation14] sm:$0xff] %v754_v15  ;;  %v762_v29 = vmul.f32 %v1501_v63, %v2018_v21  ;;  %v763_v49 = vmul.f32 %v1501_v63, %v2023_v48  ;;  %v764_v4 = vmul.f32 %v1501_v63, %v2027_v55  ;;  %v765_v6 = vmul.f32 %v1501_v63, %v2032_v59 }
 0x2ef   :  { %771 = vst [vmem:[#allocation14 + $0x8] sm:$0xff] %v755_v46  ;;  %v766_v32 = vmul.f32 %v1501_v63, %v2044_v28  ;;  %v767_v11 = vmul.f32 %v1501_v63, %v2050_v62  ;;  %v768_v30 = vmul.f32 %v1501_v63, %v2055_v43  ;;  %v769_v12 = vmul.f32 %v1501_v63, %v2062_v3 }
 0x2f0   :  { %772 = vst [vmem:[#allocation14 + $0x10] sm:$0xff] %v756_v16 }
 0x2f1   :  { %773 = vst [vmem:[#allocation14 + $0x18] sm:$0xff] %v757_v13 }
 0x2f2   :  { %774 = vst [vmem:[#allocation14 + $0x20] sm:$0xff] %v758_v34 }
 0x2f3   :  { %775 = vst [vmem:[#allocation14 + $0x28] sm:$0xff] %v759_v39 }
 0x2f4   :  { %776 = vst [vmem:[#allocation14 + $0x30] sm:$0xff] %v760_v57 }
 0x2f5   :  { %777 = vst [vmem:[#allocation14 + $0x38] sm:$0xff] %v761_v52 }
 0x2f6   :  { %778 = vst [vmem:[#allocation14 + $0x40] sm:$0xff] %v762_v29 }
 0x2f7   :  { %779 = vst [vmem:[#allocation14 + $0x48] sm:$0xff] %v763_v49 }
 0x2f8   :  { %780 = vst [vmem:[#allocation14 + $0x50] sm:$0xff] %v764_v4 }
 0x2f9   :  { %781 = vst [vmem:[#allocation14 + $0x58] sm:$0xff] %v765_v6  ;;  %v2391_v6 = vld [vmem:[#allocation22_spill] sm:$0xff] }
 0x2fa   :  { %782 = vst [vmem:[#allocation14 + $0x60] sm:$0xff] %v766_v32  ;;  %v2392_v32 = vld [vmem:[#allocation23_spill] sm:$0xff] }
 0x2fb   :  { %783 = vst [vmem:[#allocation14 + $0x68] sm:$0xff] %v767_v11 }
 0x2fc   :  { %784 = vst [vmem:[#allocation14 + $0x70] sm:$0xff] %v768_v30 }
 0x2fd   :  { %785 = vst [vmem:[#allocation14 + $0x78] sm:$0xff] %v769_v12 }
 0x315   :  { %v1287_v21 = vpop.xlane.xlu1 %1286  ;;  %v1014_v48 = vpop.xlane.xlu0 %1013 }
 0x316   :  { %v1288_v55 = vrot.slane %v1287_v21, 4  ;;  %v1015_v59 = vrot.slane %v1014_v48, 4 }
 0x318   :  { %v1289_v28 = vadd.f32 %v1288_v55, %v1287_v21  ;;  %v1016_v62 = vadd.f32 %v1015_v59, %v1014_v48 }
 0x31a   :  { %v1290_v43 = vrot.slane %v1289_v28, 2  ;;  %v1017_v3 = vrot.slane %v1016_v62, 2 }
 0x31c   :  { %v1291_v60 = vadd.f32 %v1290_v43, %v1289_v28  ;;  %v1018_v10 = vadd.f32 %v1017_v3, %v1016_v62 }
 0x31e   :  { %v1019_v17 = vrot.slane %v1018_v10, 1  ;;  %v1292_v44 = vrot.slane %v1291_v60, 1 }
 0x320   :  { %v1020_v33 = vadd.f32 %v1019_v17, %v1018_v10  ;;  %v1293_v37 = vadd.f32 %v1292_v44, %v1291_v60 }
 0x322   :  { %1482 = vpush %v1020_v33 }
 0x323   :  { %1484 = vpush %v1293_v37 }
 0x353   :  { %s1483_s6 = spop %1482 }
 0x354   :  { %v1022_v5 = vstv %s1483_s6  ;;  %s1485_s17 = spop %1484 }
 0x355   :  { %v1023_v26 = vmul.f32 %v1022_v5, %v2314_v2  ;;  %v1295_v15 = vstv %s1485_s17 }
 0x356   :  { %v1296_v46 = vmul.f32 %v1295_v15, %v2314_v2 }
 0x357   :  { %v1024_v63 = vadd.f32 1.0, %v1023_v26 }
 0x358   :  { %v1297_v52 = vadd.f32 1.0, %v1296_v46 }
 0x359   :  { %1502 = vrcp.f32 %v1024_v63 }
 0x35a   :  { %1504 = vrcp.f32 %v1297_v52 }
 0x35f   :  { %v1503_v16 = vpop.eup %1502 }
 0x360   :  { %v1026_v13 = vmul.f32 %v1503_v16, %v2162_v51  ;;  %v1027_v34 = vmul.f32 %v1503_v16, %v2153_v35  ;;  %v1028_v39 = vmul.f32 %v1503_v16, %v2170_v22  ;;  %v1029_v57 = vmul.f32 %v1503_v16, %v2184_v19 }
 0x361   :  { %v1030_v29 = vmul.f32 %v1503_v16, %v2198_v31  ;;  %v1031_v49 = vmul.f32 %v1503_v16, %v2209_v40  ;;  %v1032_v4 = vmul.f32 %v1503_v16, %v2220_v9  ;;  %v1033_v2 = vmul.f32 %v1503_v16, %v2232_v18  ;;  %v1505_v40 = vpop.eup %1504 }
 0x362   :  { %1043 = vst [vmem:[#allocation14 + $0x80] sm:$0xff] %v1026_v13  ;;  %v1034_v35 = vmul.f32 %v1503_v16, %v2242_v14  ;;  %v1035_v51 = vmul.f32 %v1503_v16, %v2252_v7  ;;  %v1036_v22 = vmul.f32 %v1503_v16, %v2262_v38  ;;  %v1037_v19 = vmul.f32 %v1503_v16, %v2274_v24 }
 0x363   :  { %1044 = vst [vmem:[#allocation14 + $0x88] sm:$0xff] %v1027_v34  ;;  %v1038_v31 = vmul.f32 %v1503_v16, %v2284_v47  ;;  %v1039_v9 = vmul.f32 %v1503_v16, %v2292_v50  ;;  %v1040_v18 = vmul.f32 %v1503_v16, %v2302_v20  ;;  %v1041_v14 = vmul.f32 %v1503_v16, %v2309_v23 }
 0x364   :  { %1045 = vst [vmem:[#allocation14 + $0x90] sm:$0xff] %v1028_v39  ;;  %v1299_v7 = vmul.f32 %v1505_v40, %v2166_v56  ;;  %v1300_v38 = vmul.f32 %v1505_v40, %v2157_v36  ;;  %v1301_v24 = vmul.f32 %v1505_v40, %v2174_v8  ;;  %v1302_v47 = vmul.f32 %v1505_v40, %v2188_v58 }
 0x365   :  { %1046 = vst [vmem:[#allocation14 + $0x98] sm:$0xff] %v1029_v57  ;;  %v1303_v50 = vmul.f32 %v1505_v40, %v2202_v27  ;;  %v1304_v20 = vmul.f32 %v1505_v40, %v2213_v0  ;;  %v1305_v23 = vmul.f32 %v1505_v40, %v2224_v54  ;;  %v1306_v56 = vmul.f32 %v1505_v40, %v2236_v61 }
 0x366   :  { %1047 = vst [vmem:[#allocation14 + $0xa0] sm:$0xff] %v1030_v29  ;;  %v1307_v36 = vmul.f32 %v1505_v40, %v2246_v41  ;;  %v1308_v8 = vmul.f32 %v1505_v40, %v2391_v6  ;;  %v1309_v58 = vmul.f32 %v1505_v40, %v2392_v32  ;;  %v1310_v27 = vmul.f32 %v1505_v40, %v2278_v53 }
 0x367   :  { %1048 = vst [vmem:[#allocation14 + $0xa8] sm:$0xff] %v1031_v49  ;;  %v1311_v0 = vmul.f32 %v1505_v40, %v2288_v42  ;;  %v1312_v54 = vmul.f32 %v1505_v40, %v2294_v45  ;;  %v1313_v61 = vmul.f32 %v1505_v40, %v2300_v25  ;;  %v1314_v41 = vmul.f32 %v1505_v40, %v2306_v1 }
 0x368   :  { %1049 = vst [vmem:[#allocation14 + $0xb0] sm:$0xff] %v1032_v4 }
 0x369   :  { %1050 = vst [vmem:[#allocation14 + $0xb8] sm:$0xff] %v1033_v2 }
 0x36a   :  { %1051 = vst [vmem:[#allocation14 + $0xc0] sm:$0xff] %v1034_v35 }
 0x36b   :  { %1052 = vst [vmem:[#allocation14 + $0xc8] sm:$0xff] %v1035_v51 }
 0x36c   :  { %1053 = vst [vmem:[#allocation14 + $0xd0] sm:$0xff] %v1036_v22 }
 0x36d   :  { %1054 = vst [vmem:[#allocation14 + $0xd8] sm:$0xff] %v1037_v19 }
 0x36e   :  { %1055 = vst [vmem:[#allocation14 + $0xe0] sm:$0xff] %v1038_v31 }
 0x36f   :  { %1056 = vst [vmem:[#allocation14 + $0xe8] sm:$0xff] %v1039_v9 }
 0x370   :  { %1057 = vst [vmem:[#allocation14 + $0xf0] sm:$0xff] %v1040_v18 }
 0x371   :  { %1058 = vst [vmem:[#allocation14 + $0xf8] sm:$0xff] %v1041_v14 }
 0x372   :  { %1316 = vst [vmem:[#allocation14 + $0x100] sm:$0xff] %v1299_v7 }
 0x373   :  { %1317 = vst [vmem:[#allocation14 + $0x108] sm:$0xff] %v1300_v38 }
 0x374   :  { %1318 = vst [vmem:[#allocation14 + $0x110] sm:$0xff] %v1301_v24 }
 0x375   :  { %1319 = vst [vmem:[#allocation14 + $0x118] sm:$0xff] %v1302_v47 }
 0x376   :  { %1320 = vst [vmem:[#allocation14 + $0x120] sm:$0xff] %v1303_v50 }
 0x377   :  { %1321 = vst [vmem:[#allocation14 + $0x128] sm:$0xff] %v1304_v20 }
 0x378   :  { %1322 = vst [vmem:[#allocation14 + $0x130] sm:$0xff] %v1305_v23 }
 0x379   :  { %1323 = vst [vmem:[#allocation14 + $0x138] sm:$0xff] %v1306_v56 }
 0x37a   :  { %1324 = vst [vmem:[#allocation14 + $0x140] sm:$0xff] %v1307_v36 }
 0x37b   :  { %1325 = vst [vmem:[#allocation14 + $0x148] sm:$0xff] %v1308_v8 }
 0x37c   :  { %1326 = vst [vmem:[#allocation14 + $0x150] sm:$0xff] %v1309_v58 }
 0x37d   :  { %1327 = vst [vmem:[#allocation14 + $0x158] sm:$0xff] %v1310_v27 }
 0x37e   :  { %1328 = vst [vmem:[#allocation14 + $0x160] sm:$0xff] %v1311_v0 }
 0x37f   :  { %1329 = vst [vmem:[#allocation14 + $0x168] sm:$0xff] %v1312_v54 }
 0x380   :  { %1330 = vst [vmem:[#allocation14 + $0x170] sm:$0xff] %v1313_v61 }
 0x381   :  { %1331 = vst [vmem:[#allocation14 + $0x178] sm:$0xff] %v1314_v41 }
 0x382   :  { %1357 = dma.vmem_to_hbm [thread:$0]  %s1350_s19, 6144, %s1352_s21, [#allocation15], %s1702_s2, %s1702_s2, %s1703_s16  }
 0x383   :  { %1694 = dma.done.wait [#allocation4], 6144  }
 0x384   :  { %1695 = vsyncadd [#allocation4], 4294961152 }
 0x385   :  { %1696 = dma.done.wait [#allocation15], 6144  }
 0x386   :  { %1697 = vsyncadd [#allocation15], 4294961152 }
 0x387   :  { %1366 = vsyncpa [#allocation3], 1 }
 0x388   :  { %1367 = vsyncpa [#allocation8], 1 }
 0x389   :  { %1368 = vsyncpa [#allocation11], 1 }
 0x38a   :  { %1369 = vsyncpa [#allocation4], 1 }
 0x38b   :  { %1370 = vsyncpa [#allocation15], 1 }
 0x38c   :  { %1371 = vsyncpa [#allocation5], 1 }

</bundles_post_ra>
